<compile_context>
chip_gen: v6e
topology: v6e:2x2x1
jax: 0.10.0
libtpu: 0.0.40
codegen_flags: <defaults>
</compile_context>

<pallas_src>
import jax
import jax.numpy as jnp
from jax.experimental import pallas as pl
from jax.experimental.pallas import tpu as pltpu

_LANE = 128


def _round_up(x, m):
    return ((x + m - 1) // m) * m


def batched_radial_flow(z, x0, alpha_prime, beta_prime, *,
                        lane_tile=1024, transpose_output=True):
    """Forward of BatchedNormalizingFlowDensity with flow_type='radial_flow'.

    z            : (N, dim) float32
    x0           : (c, L, dim) float32   (flow centers per class/layer)
    alpha_prime  : (c, L) float32
    beta_prime   : (c, L) float32
    returns (z_out (c, N, dim), sum_log_jacobians (c, N))
    """
    c, flow_length, dim = x0.shape
    n = z.shape[0]

    # pyro Radial invertibility constraint (plain-JAX glue).
    alpha = jax.nn.softplus(alpha_prime).astype(jnp.float32)              # (c, L)
    beta = (-alpha + jax.nn.softplus(beta_prime)).astype(jnp.float32)     # (c, L)
    alpha_flat = alpha.reshape(c * flow_length)         # 1-D SMEM: no (8,128) padding
    beta_flat = beta.reshape(c * flow_length)
    x0_flat = x0.astype(jnp.float32).reshape(c * flow_length * dim)

    # Sample packing: ts sublanes x tl lanes per tile (lane dim multiple of 128).
    ts = 8
    tl = min(max(_round_up(lane_tile // ts, _LANE), _LANE),
             _round_up(pl.cdiv(n, ts), _LANE))
    tn = ts * tl
    n_tiles = pl.cdiv(n, tn)
    n_pad = n_tiles * tn

    # Small N (single sample tile): classes go on a parallel grid axis so both
    # v7x TensorCores get work.  Otherwise keep the class loop inside one grid
    # step (fewer steps -> per-step overhead amortized over c*L layers).
    cb = c if n_tiles >= 2 else 1
    n_class_blocks = c // cb

    # Lane-dense relayout (plumbing done by XLA outside the kernel):
    # sample s of tile i lives at (sublane i*8 + s//tl, lane s%tl).
    z_t = jnp.transpose(z.astype(jnp.float32))           # (dim, n)
    if n_pad != n:
        z_t = jnp.pad(z_t, ((0, 0), (0, n_pad - n)))
    z_t = z_t.reshape(dim, n_tiles * ts, tl)

    def kernel(alpha_ref, beta_ref, x0_ref, z_ref, zout_ref, slj_ref):
        # alpha_ref, beta_ref : SMEM (c*L,)      constrained alpha / beta
        # x0_ref              : SMEM (c*L*dim,)  flow centers, scalar splats
        # z_ref               : VMEM (dim, ts, tl)
        # zout_ref            : VMEM (cb, dim, ts, tl)
        # slj_ref             : VMEM (cb, ts, tl)
        cblk = pl.program_id(0)
        for ci in range(cb):
            cls = cblk * cb + ci
            # Re-load z per class from VMEM (cheap) -> keeps live vregs low.
            zr = [z_ref[d, :, :] for d in range(dim)]
            slj = jnp.zeros((ts, tl), jnp.float32)
            # TODO(synk): switch the layer loop to lax.fori_loop(..., unroll=True)
            # with pl.ds SMEM indexing if flow_length grows beyond ~16.
            for l in range(flow_length):
                j = cls * flow_length + l
                a = alpha_ref[j]                           # SMEM scalar reads
                b = beta_ref[j]
                # r^2 via dim-1 full-vreg VALU adds (no XLU sublane reduce).
                diffs = []
                r2 = None
                for d in range(dim):
                    dd = zr[d] - x0_ref[j * dim + d]       # scalar->vreg splat
                    diffs.append(dd)
                    sq = dd * dd
                    r2 = sq if r2 is None else r2 + sq
                r = jnp.sqrt(r2)                           # (ts, tl), EUP
                # h = 1/(alpha + r): approx EUP reciprocal + one Newton step.
                denom = a + r
                h0 = pl.reciprocal(denom, approx=True)
                h = h0 * (2.0 - denom * h0)
                bh = b * h
                for d in range(dim):                       # radial transform
                    zr[d] = zr[d] + bh * diffs[d]
                one_bh = 1.0 + bh
                # log|det J| = (dim-1)*log(1+bh) + log(1+bh - beta*h^2*r),
                # kept as two EUP logs (EUP has slack; no fused-pow overflow).
                log_det = (dim - 1) * jnp.log(one_bh) + jnp.log(one_bh - bh * h * r)
                slj = slj + log_det
            for d in range(dim):
                zout_ref[ci, d, :, :] = zr[d]              # lane-dense stores
            slj_ref[ci, :, :] = slj

    cost = pl.CostEstimate(
        flops=c * flow_length * n_pad * (5 * dim + 12),
        transcendentals=c * flow_length * n_pad * 4,       # sqrt + rcp + 2 logs
        bytes_accessed=4 * (n_pad * dim * (c if cb == 1 else 1)
                            + c * n_pad * (dim + 1)
                            + c * flow_length * (dim + 2)),
    )

    z_out_t, slj_pad = pl.pallas_call(
        kernel,
        out_shape=(
            jax.ShapeDtypeStruct((c, dim, n_tiles * ts, tl), jnp.float32),
            jax.ShapeDtypeStruct((c, n_tiles * ts, tl), jnp.float32),
        ),
        grid_spec=pltpu.PrefetchScalarGridSpec(
            num_scalar_prefetch=0,
            grid=(n_class_blocks, n_tiles),
            in_specs=[
                pl.BlockSpec(memory_space=pltpu.MemorySpace.SMEM),     # alpha (c*L,)
                pl.BlockSpec(memory_space=pltpu.MemorySpace.SMEM),     # beta  (c*L,)
                pl.BlockSpec(memory_space=pltpu.MemorySpace.SMEM),     # x0    (c*L*dim,)
                pl.BlockSpec((dim, ts, tl), lambda g, i: (0, i, 0)),   # z tile
            ],
            out_specs=[
                pl.BlockSpec((cb, dim, ts, tl), lambda g, i: (g, 0, i, 0)),
                pl.BlockSpec((cb, ts, tl), lambda g, i: (g, i, 0)),
            ],
        ),
        compiler_params=pltpu.CompilerParams(
            dimension_semantics=("parallel", "parallel")),  # shards across TCs on v7x
        cost_estimate=cost,
    )(alpha_flat, beta_flat, x0_flat, z_t)

    z_out = z_out_t.reshape(c, dim, n_pad)[:, :, :n]        # (c, dim, N) lane-dense
    slj = slj_pad.reshape(c, n_pad)[:, :n]                  # (c, N)
    if transpose_output:
        z_out = jnp.transpose(z_out, (0, 2, 1))             # torch layout (c, N, dim)
    return z_out, slj


def _reference_forward(z, x0, alpha, beta):
    """Pure-JAX reference mirroring the torch module's forward."""
    c, flow_length, dim = x0.shape
    zc = jnp.broadcast_to(z[None], (c,) + z.shape)           # z.repeat(c, 1, 1)
    slj = jnp.zeros((c, z.shape[0]), jnp.float32)
    for l in range(flow_length):
        x0_l = x0[:, l][:, None, :]                          # (c, 1, dim)
        a = alpha[:, l][:, None, None]
        b = beta[:, l][:, None, None]
        diff = zc - x0_l
        r = jnp.sqrt(jnp.sum(diff * diff, axis=-1, keepdims=True))
        h = 1.0 / (a + r)
        bh = b * h
        zc = zc + bh * diff
        ld = (dim - 1) * jnp.log(1.0 + bh) + jnp.log(1.0 + bh - b * h * h * r)
        slj = slj + ld[..., 0]
    return zc, slj


if __name__ == "__main__":
    key = jax.random.PRNGKey(0)
    c, dim, flow_length = 4, 8, 6

    k1, k2, k3, k4, k5 = jax.random.split(key, 5)
    stdv = 1.0 / (dim ** 0.5)   # same init scale as pyro Radial.reset_parameters
    x0 = jax.random.uniform(k1, (c, flow_length, dim), jnp.float32, -stdv, stdv)
    alpha_prime = jax.random.uniform(k2, (c, flow_length), jnp.float32, -stdv, stdv)
    beta_prime = jax.random.uniform(k3, (c, flow_length), jnp.float32, -stdv, stdv)

    alpha = jax.nn.softplus(alpha_prime)
    beta = -alpha + jax.nn.softplus(beta_prime)

    # batch=16 exercises the classes-on-grid (small-N / v7x megacore) path;
    # batch=2100 exercises multi-tile + class-loop-inside path with padding.
    for batch, kz in ((16, k4), (2100, k5)):
        z = jax.random.normal(kz, (batch, dim), jnp.float32)

        z_out, slj = batched_radial_flow(z, x0, alpha_prime, beta_prime)
        jax.block_until_ready((z_out, slj))

        z_ref, slj_ref = _reference_forward(z, x0, alpha, beta)

        assert z_out.shape == (c, batch, dim) and slj.shape == (c, batch)
        # Tolerance accounts for the Newton-refined approx reciprocal (~1e-6 level).
        assert jnp.allclose(z_out, z_ref, rtol=1e-4, atol=1e-4), \
            float(jnp.max(jnp.abs(z_out - z_ref)))
        assert jnp.allclose(slj, slj_ref, rtol=1e-4, atol=1e-4), \
            float(jnp.max(jnp.abs(slj - slj_ref)))

    print("KERNEL_OK")
</pallas_src>

<mosaic_0001>
module attributes {stable_mosaic.version = 11 : i64} {
  func.func @kernel(%arg0: i32, %arg1: i32, %arg2: memref<24xf32, #tpu.memory_space<smem>>, %arg3: memref<24xf32, #tpu.memory_space<smem>>, %arg4: memref<192xf32, #tpu.memory_space<smem>>, %arg5: memref<8x8x128xf32, #tpu.memory_space<vmem>>, %arg6: memref<1x8x8x128xf32, #tpu.memory_space<vmem>>, %arg7: memref<1x8x128xf32, #tpu.memory_space<vmem>>) attributes {dimension_semantics = [#tpu.dimension_semantics<parallel>, #tpu.dimension_semantics<parallel>], iteration_bounds = array<i64: 4, 1>, scalar_prefetch = 0 : i64, scratch_operands = 0 : i64, tpu.core_type = #tpu.core_type<tc>, window_params = [{transform_indices = @transform_0, window_bounds = array<i64: 24>}, {transform_indices = @transform_1, window_bounds = array<i64: 24>}, {transform_indices = @transform_2, window_bounds = array<i64: 192>}, {transform_indices = @transform_3, window_bounds = array<i64: 8, 8, 128>}, {transform_indices = @transform_4, window_bounds = array<i64: 1, 8, 8, 128>}, {transform_indices = @transform_5, window_bounds = array<i64: 1, 8, 128>}]} {
    %c1_i32 = arith.constant 1 : i32
    %0 = arith.muli %arg0, %c1_i32 : i32
    %c0_i32 = arith.constant 0 : i32
    %1 = arith.addi %0, %c0_i32 : i32
    %c0 = arith.constant 0 : index
    %c0_0 = arith.constant 0 : index
    %c0_1 = arith.constant 0 : index
    %2 = vector.load %arg5[%c0, %c0_0, %c0_1] : memref<8x8x128xf32, #tpu.memory_space<vmem>>, vector<1x8x128xf32>
    %3 = vector.shape_cast %2 : vector<1x8x128xf32> to vector<8x128xf32>
    %c1 = arith.constant 1 : index
    %c0_2 = arith.constant 0 : index
    %c0_3 = arith.constant 0 : index
    %4 = vector.load %arg5[%c1, %c0_2, %c0_3] : memref<8x8x128xf32, #tpu.memory_space<vmem>>, vector<1x8x128xf32>
    %5 = vector.shape_cast %4 : vector<1x8x128xf32> to vector<8x128xf32>
    %c2 = arith.constant 2 : index
    %c0_4 = arith.constant 0 : index
    %c0_5 = arith.constant 0 : index
    %6 = vector.load %arg5[%c2, %c0_4, %c0_5] : memref<8x8x128xf32, #tpu.memory_space<vmem>>, vector<1x8x128xf32>
    %7 = vector.shape_cast %6 : vector<1x8x128xf32> to vector<8x128xf32>
    %c3 = arith.constant 3 : index
    %c0_6 = arith.constant 0 : index
    %c0_7 = arith.constant 0 : index
    %8 = vector.load %arg5[%c3, %c0_6, %c0_7] : memref<8x8x128xf32, #tpu.memory_space<vmem>>, vector<1x8x128xf32>
    %9 = vector.shape_cast %8 : vector<1x8x128xf32> to vector<8x128xf32>
    %c4 = arith.constant 4 : index
    %c0_8 = arith.constant 0 : index
    %c0_9 = arith.constant 0 : index
    %10 = vector.load %arg5[%c4, %c0_8, %c0_9] : memref<8x8x128xf32, #tpu.memory_space<vmem>>, vector<1x8x128xf32>
    %11 = vector.shape_cast %10 : vector<1x8x128xf32> to vector<8x128xf32>
    %c5 = arith.constant 5 : index
    %c0_10 = arith.constant 0 : index
    %c0_11 = arith.constant 0 : index
    %12 = vector.load %arg5[%c5, %c0_10, %c0_11] : memref<8x8x128xf32, #tpu.memory_space<vmem>>, vector<1x8x128xf32>
    %13 = vector.shape_cast %12 : vector<1x8x128xf32> to vector<8x128xf32>
    %c6 = arith.constant 6 : index
    %c0_12 = arith.constant 0 : index
    %c0_13 = arith.constant 0 : index
    %14 = vector.load %arg5[%c6, %c0_12, %c0_13] : memref<8x8x128xf32, #tpu.memory_space<vmem>>, vector<1x8x128xf32>
    %15 = vector.shape_cast %14 : vector<1x8x128xf32> to vector<8x128xf32>
    %c7 = arith.constant 7 : index
    %c0_14 = arith.constant 0 : index
    %c0_15 = arith.constant 0 : index
    %16 = vector.load %arg5[%c7, %c0_14, %c0_15] : memref<8x8x128xf32, #tpu.memory_space<vmem>>, vector<1x8x128xf32>
    %17 = vector.shape_cast %16 : vector<1x8x128xf32> to vector<8x128xf32>
    %cst = arith.constant 0.000000e+00 : f32
    %18 = vector.broadcast %cst : f32 to vector<8x128xf32>
    %c6_i32 = arith.constant 6 : i32
    %19 = arith.muli %1, %c6_i32 : i32
    %c0_i32_16 = arith.constant 0 : i32
    %20 = arith.addi %19, %c0_i32_16 : i32
    %21 = arith.index_cast %20 : i32 to index
    %22 = memref.load %arg2[%21] : memref<24xf32, #tpu.memory_space<smem>>
    %23 = arith.index_cast %20 : i32 to index
    %24 = memref.load %arg3[%23] : memref<24xf32, #tpu.memory_space<smem>>
    %c8_i32 = arith.constant 8 : i32
    %25 = arith.muli %20, %c8_i32 : i32
    %c0_i32_17 = arith.constant 0 : i32
    %26 = arith.addi %25, %c0_i32_17 : i32
    %27 = arith.index_cast %26 : i32 to index
    %28 = memref.load %arg4[%27] : memref<192xf32, #tpu.memory_space<smem>>
    %29 = vector.broadcast %28 : f32 to vector<8x128xf32>
    %30 = arith.subf %3, %29 : vector<8x128xf32>
    %31 = arith.mulf %30, %30 : vector<8x128xf32>
    %c8_i32_18 = arith.constant 8 : i32
    %32 = arith.muli %20, %c8_i32_18 : i32
    %c1_i32_19 = arith.constant 1 : i32
    %33 = arith.addi %32, %c1_i32_19 : i32
    %34 = arith.index_cast %33 : i32 to index
    %35 = memref.load %arg4[%34] : memref<192xf32, #tpu.memory_space<smem>>
    %36 = vector.broadcast %35 : f32 to vector<8x128xf32>
    %37 = arith.subf %5, %36 : vector<8x128xf32>
    %38 = arith.mulf %37, %37 : vector<8x128xf32>
    %39 = arith.addf %31, %38 : vector<8x128xf32>
    %c8_i32_20 = arith.constant 8 : i32
    %40 = arith.muli %20, %c8_i32_20 : i32
    %c2_i32 = arith.constant 2 : i32
    %41 = arith.addi %40, %c2_i32 : i32
    %42 = arith.index_cast %41 : i32 to index
    %43 = memref.load %arg4[%42] : memref<192xf32, #tpu.memory_space<smem>>
    %44 = vector.broadcast %43 : f32 to vector<8x128xf32>
    %45 = arith.subf %7, %44 : vector<8x128xf32>
    %46 = arith.mulf %45, %45 : vector<8x128xf32>
    %47 = arith.addf %39, %46 : vector<8x128xf32>
    %c8_i32_21 = arith.constant 8 : i32
    %48 = arith.muli %20, %c8_i32_21 : i32
    %c3_i32 = arith.constant 3 : i32
    %49 = arith.addi %48, %c3_i32 : i32
    %50 = arith.index_cast %49 : i32 to index
    %51 = memref.load %arg4[%50] : memref<192xf32, #tpu.memory_space<smem>>
    %52 = vector.broadcast %51 : f32 to vector<8x128xf32>
    %53 = arith.subf %9, %52 : vector<8x128xf32>
    %54 = arith.mulf %53, %53 : vector<8x128xf32>
    %55 = arith.addf %47, %54 : vector<8x128xf32>
    %c8_i32_22 = arith.constant 8 : i32
    %56 = arith.muli %20, %c8_i32_22 : i32
    %c4_i32 = arith.constant 4 : i32
    %57 = arith.addi %56, %c4_i32 : i32
    %58 = arith.index_cast %57 : i32 to index
    %59 = memref.load %arg4[%58] : memref<192xf32, #tpu.memory_space<smem>>
    %60 = vector.broadcast %59 : f32 to vector<8x128xf32>
    %61 = arith.subf %11, %60 : vector<8x128xf32>
    %62 = arith.mulf %61, %61 : vector<8x128xf32>
    %63 = arith.addf %55, %62 : vector<8x128xf32>
    %c8_i32_23 = arith.constant 8 : i32
    %64 = arith.muli %20, %c8_i32_23 : i32
    %c5_i32 = arith.constant 5 : i32
    %65 = arith.addi %64, %c5_i32 : i32
    %66 = arith.index_cast %65 : i32 to index
    %67 = memref.load %arg4[%66] : memref<192xf32, #tpu.memory_space<smem>>
    %68 = vector.broadcast %67 : f32 to vector<8x128xf32>
    %69 = arith.subf %13, %68 : vector<8x128xf32>
    %70 = arith.mulf %69, %69 : vector<8x128xf32>
    %71 = arith.addf %63, %70 : vector<8x128xf32>
    %c8_i32_24 = arith.constant 8 : i32
    %72 = arith.muli %20, %c8_i32_24 : i32
    %c6_i32_25 = arith.constant 6 : i32
    %73 = arith.addi %72, %c6_i32_25 : i32
    %74 = arith.index_cast %73 : i32 to index
    %75 = memref.load %arg4[%74] : memref<192xf32, #tpu.memory_space<smem>>
    %76 = vector.broadcast %75 : f32 to vector<8x128xf32>
    %77 = arith.subf %15, %76 : vector<8x128xf32>
    %78 = arith.mulf %77, %77 : vector<8x128xf32>
    %79 = arith.addf %71, %78 : vector<8x128xf32>
    %c8_i32_26 = arith.constant 8 : i32
    %80 = arith.muli %20, %c8_i32_26 : i32
    %c7_i32 = arith.constant 7 : i32
    %81 = arith.addi %80, %c7_i32 : i32
    %82 = arith.index_cast %81 : i32 to index
    %83 = memref.load %arg4[%82] : memref<192xf32, #tpu.memory_space<smem>>
    %84 = vector.broadcast %83 : f32 to vector<8x128xf32>
    %85 = arith.subf %17, %84 : vector<8x128xf32>
    %86 = arith.mulf %85, %85 : vector<8x128xf32>
    %87 = arith.addf %79, %86 : vector<8x128xf32>
    %88 = math.sqrt %87 : vector<8x128xf32>
    %89 = vector.broadcast %22 : f32 to vector<8x128xf32>
    %90 = arith.addf %89, %88 : vector<8x128xf32>
    %91 = tpu.reciprocal %90 {approx = true} : vector<8x128xf32> -> vector<8x128xf32>
    %92 = arith.mulf %90, %91 : vector<8x128xf32>
    %cst_27 = arith.constant 2.000000e+00 : f32
    %93 = vector.broadcast %cst_27 : f32 to vector<8x128xf32>
    %94 = arith.subf %93, %92 : vector<8x128xf32>
    %95 = arith.mulf %91, %94 : vector<8x128xf32>
    %96 = vector.broadcast %24 : f32 to vector<8x128xf32>
    %97 = arith.mulf %96, %95 : vector<8x128xf32>
    %98 = arith.mulf %97, %30 : vector<8x128xf32>
    %99 = arith.addf %3, %98 : vector<8x128xf32>
    %100 = arith.mulf %97, %37 : vector<8x128xf32>
    %101 = arith.addf %5, %100 : vector<8x128xf32>
    %102 = arith.mulf %97, %45 : vector<8x128xf32>
    %103 = arith.addf %7, %102 : vector<8x128xf32>
    %104 = arith.mulf %97, %53 : vector<8x128xf32>
    %105 = arith.addf %9, %104 : vector<8x128xf32>
    %106 = arith.mulf %97, %61 : vector<8x128xf32>
    %107 = arith.addf %11, %106 : vector<8x128xf32>
    %108 = arith.mulf %97, %69 : vector<8x128xf32>
    %109 = arith.addf %13, %108 : vector<8x128xf32>
    %110 = arith.mulf %97, %77 : vector<8x128xf32>
    %111 = arith.addf %15, %110 : vector<8x128xf32>
    %112 = arith.mulf %97, %85 : vector<8x128xf32>
    %113 = arith.addf %17, %112 : vector<8x128xf32>
    %cst_28 = arith.constant 1.000000e+00 : f32
    %114 = vector.broadcast %cst_28 : f32 to vector<8x128xf32>
    %115 = arith.addf %114, %97 : vector<8x128xf32>
    %116 = math.log %115 : vector<8x128xf32>
    %cst_29 = arith.constant 7.000000e+00 : f32
    %117 = vector.broadcast %cst_29 : f32 to vector<8x128xf32>
    %118 = arith.mulf %117, %116 : vector<8x128xf32>
    %119 = arith.mulf %97, %95 : vector<8x128xf32>
    %120 = arith.mulf %119, %88 : vector<8x128xf32>
    %121 = arith.subf %115, %120 : vector<8x128xf32>
    %122 = math.log %121 : vector<8x128xf32>
    %123 = arith.addf %118, %122 : vector<8x128xf32>
    %124 = arith.addf %18, %123 : vector<8x128xf32>
    %c6_i32_30 = arith.constant 6 : i32
    %125 = arith.muli %1, %c6_i32_30 : i32
    %c1_i32_31 = arith.constant 1 : i32
    %126 = arith.addi %125, %c1_i32_31 : i32
    %127 = arith.index_cast %126 : i32 to index
    %128 = memref.load %arg2[%127] : memref<24xf32, #tpu.memory_space<smem>>
    %129 = arith.index_cast %126 : i32 to index
    %130 = memref.load %arg3[%129] : memref<24xf32, #tpu.memory_space<smem>>
    %c8_i32_32 = arith.constant 8 : i32
    %131 = arith.muli %126, %c8_i32_32 : i32
    %c0_i32_33 = arith.constant 0 : i32
    %132 = arith.addi %131, %c0_i32_33 : i32
    %133 = arith.index_cast %132 : i32 to index
    %134 = memref.load %arg4[%133] : memref<192xf32, #tpu.memory_space<smem>>
    %135 = vector.broadcast %134 : f32 to vector<8x128xf32>
    %136 = arith.subf %99, %135 : vector<8x128xf32>
    %137 = arith.mulf %136, %136 : vector<8x128xf32>
    %c8_i32_34 = arith.constant 8 : i32
    %138 = arith.muli %126, %c8_i32_34 : i32
    %c1_i32_35 = arith.constant 1 : i32
    %139 = arith.addi %138, %c1_i32_35 : i32
    %140 = arith.index_cast %139 : i32 to index
    %141 = memref.load %arg4[%140] : memref<192xf32, #tpu.memory_space<smem>>
    %142 = vector.broadcast %141 : f32 to vector<8x128xf32>
    %143 = arith.subf %101, %142 : vector<8x128xf32>
    %144 = arith.mulf %143, %143 : vector<8x128xf32>
    %145 = arith.addf %137, %144 : vector<8x128xf32>
    %c8_i32_36 = arith.constant 8 : i32
    %146 = arith.muli %126, %c8_i32_36 : i32
    %c2_i32_37 = arith.constant 2 : i32
    %147 = arith.addi %146, %c2_i32_37 : i32
    %148 = arith.index_cast %147 : i32 to index
    %149 = memref.load %arg4[%148] : memref<192xf32, #tpu.memory_space<smem>>
    %150 = vector.broadcast %149 : f32 to vector<8x128xf32>
    %151 = arith.subf %103, %150 : vector<8x128xf32>
    %152 = arith.mulf %151, %151 : vector<8x128xf32>
    %153 = arith.addf %145, %152 : vector<8x128xf32>
    %c8_i32_38 = arith.constant 8 : i32
    %154 = arith.muli %126, %c8_i32_38 : i32
    %c3_i32_39 = arith.constant 3 : i32
    %155 = arith.addi %154, %c3_i32_39 : i32
    %156 = arith.index_cast %155 : i32 to index
    %157 = memref.load %arg4[%156] : memref<192xf32, #tpu.memory_space<smem>>
    %158 = vector.broadcast %157 : f32 to vector<8x128xf32>
    %159 = arith.subf %105, %158 : vector<8x128xf32>
    %160 = arith.mulf %159, %159 : vector<8x128xf32>
    %161 = arith.addf %153, %160 : vector<8x128xf32>
    %c8_i32_40 = arith.constant 8 : i32
    %162 = arith.muli %126, %c8_i32_40 : i32
    %c4_i32_41 = arith.constant 4 : i32
    %163 = arith.addi %162, %c4_i32_41 : i32
    %164 = arith.index_cast %163 : i32 to index
    %165 = memref.load %arg4[%164] : memref<192xf32, #tpu.memory_space<smem>>
    %166 = vector.broadcast %165 : f32 to vector<8x128xf32>
    %167 = arith.subf %107, %166 : vector<8x128xf32>
    %168 = arith.mulf %167, %167 : vector<8x128xf32>
    %169 = arith.addf %161, %168 : vector<8x128xf32>
    %c8_i32_42 = arith.constant 8 : i32
    %170 = arith.muli %126, %c8_i32_42 : i32
    %c5_i32_43 = arith.constant 5 : i32
    %171 = arith.addi %170, %c5_i32_43 : i32
    %172 = arith.index_cast %171 : i32 to index
    %173 = memref.load %arg4[%172] : memref<192xf32, #tpu.memory_space<smem>>
    %174 = vector.broadcast %173 : f32 to vector<8x128xf32>
    %175 = arith.subf %109, %174 : vector<8x128xf32>
    %176 = arith.mulf %175, %175 : vector<8x128xf32>
    %177 = arith.addf %169, %176 : vector<8x128xf32>
    %c8_i32_44 = arith.constant 8 : i32
    %178 = arith.muli %126, %c8_i32_44 : i32
    %c6_i32_45 = arith.constant 6 : i32
    %179 = arith.addi %178, %c6_i32_45 : i32
    %180 = arith.index_cast %179 : i32 to index
    %181 = memref.load %arg4[%180] : memref<192xf32, #tpu.memory_space<smem>>
    %182 = vector.broadcast %181 : f32 to vector<8x128xf32>
    %183 = arith.subf %111, %182 : vector<8x128xf32>
    %184 = arith.mulf %183, %183 : vector<8x128xf32>
    %185 = arith.addf %177, %184 : vector<8x128xf32>
    %c8_i32_46 = arith.constant 8 : i32
    %186 = arith.muli %126, %c8_i32_46 : i32
    %c7_i32_47 = arith.constant 7 : i32
    %187 = arith.addi %186, %c7_i32_47 : i32
    %188 = arith.index_cast %187 : i32 to index
    %189 = memref.load %arg4[%188] : memref<192xf32, #tpu.memory_space<smem>>
    %190 = vector.broadcast %189 : f32 to vector<8x128xf32>
    %191 = arith.subf %113, %190 : vector<8x128xf32>
    %192 = arith.mulf %191, %191 : vector<8x128xf32>
    %193 = arith.addf %185, %192 : vector<8x128xf32>
    %194 = math.sqrt %193 : vector<8x128xf32>
    %195 = vector.broadcast %128 : f32 to vector<8x128xf32>
    %196 = arith.addf %195, %194 : vector<8x128xf32>
    %197 = tpu.reciprocal %196 {approx = true} : vector<8x128xf32> -> vector<8x128xf32>
    %198 = arith.mulf %196, %197 : vector<8x128xf32>
    %cst_48 = arith.constant 2.000000e+00 : f32
    %199 = vector.broadcast %cst_48 : f32 to vector<8x128xf32>
    %200 = arith.subf %199, %198 : vector<8x128xf32>
    %201 = arith.mulf %197, %200 : vector<8x128xf32>
    %202 = vector.broadcast %130 : f32 to vector<8x128xf32>
    %203 = arith.mulf %202, %201 : vector<8x128xf32>
    %204 = arith.mulf %203, %136 : vector<8x128xf32>
    %205 = arith.addf %99, %204 : vector<8x128xf32>
    %206 = arith.mulf %203, %143 : vector<8x128xf32>
    %207 = arith.addf %101, %206 : vector<8x128xf32>
    %208 = arith.mulf %203, %151 : vector<8x128xf32>
    %209 = arith.addf %103, %208 : vector<8x128xf32>
    %210 = arith.mulf %203, %159 : vector<8x128xf32>
    %211 = arith.addf %105, %210 : vector<8x128xf32>
    %212 = arith.mulf %203, %167 : vector<8x128xf32>
    %213 = arith.addf %107, %212 : vector<8x128xf32>
    %214 = arith.mulf %203, %175 : vector<8x128xf32>
    %215 = arith.addf %109, %214 : vector<8x128xf32>
    %216 = arith.mulf %203, %183 : vector<8x128xf32>
    %217 = arith.addf %111, %216 : vector<8x128xf32>
    %218 = arith.mulf %203, %191 : vector<8x128xf32>
    %219 = arith.addf %113, %218 : vector<8x128xf32>
    %cst_49 = arith.constant 1.000000e+00 : f32
    %220 = vector.broadcast %cst_49 : f32 to vector<8x128xf32>
    %221 = arith.addf %220, %203 : vector<8x128xf32>
    %222 = math.log %221 : vector<8x128xf32>
    %cst_50 = arith.constant 7.000000e+00 : f32
    %223 = vector.broadcast %cst_50 : f32 to vector<8x128xf32>
    %224 = arith.mulf %223, %222 : vector<8x128xf32>
    %225 = arith.mulf %203, %201 : vector<8x128xf32>
    %226 = arith.mulf %225, %194 : vector<8x128xf32>
    %227 = arith.subf %221, %226 : vector<8x128xf32>
    %228 = math.log %227 : vector<8x128xf32>
    %229 = arith.addf %224, %228 : vector<8x128xf32>
    %230 = arith.addf %124, %229 : vector<8x128xf32>
    %c6_i32_51 = arith.constant 6 : i32
    %231 = arith.muli %1, %c6_i32_51 : i32
    %c2_i32_52 = arith.constant 2 : i32
    %232 = arith.addi %231, %c2_i32_52 : i32
    %233 = arith.index_cast %232 : i32 to index
    %234 = memref.load %arg2[%233] : memref<24xf32, #tpu.memory_space<smem>>
    %235 = arith.index_cast %232 : i32 to index
    %236 = memref.load %arg3[%235] : memref<24xf32, #tpu.memory_space<smem>>
    %c8_i32_53 = arith.constant 8 : i32
    %237 = arith.muli %232, %c8_i32_53 : i32
    %c0_i32_54 = arith.constant 0 : i32
    %238 = arith.addi %237, %c0_i32_54 : i32
    %239 = arith.index_cast %238 : i32 to index
    %240 = memref.load %arg4[%239] : memref<192xf32, #tpu.memory_space<smem>>
    %241 = vector.broadcast %240 : f32 to vector<8x128xf32>
    %242 = arith.subf %205, %241 : vector<8x128xf32>
    %243 = arith.mulf %242, %242 : vector<8x128xf32>
    %c8_i32_55 = arith.constant 8 : i32
    %244 = arith.muli %232, %c8_i32_55 : i32
    %c1_i32_56 = arith.constant 1 : i32
    %245 = arith.addi %244, %c1_i32_56 : i32
    %246 = arith.index_cast %245 : i32 to index
    %247 = memref.load %arg4[%246] : memref<192xf32, #tpu.memory_space<smem>>
    %248 = vector.broadcast %247 : f32 to vector<8x128xf32>
    %249 = arith.subf %207, %248 : vector<8x128xf32>
    %250 = arith.mulf %249, %249 : vector<8x128xf32>
    %251 = arith.addf %243, %250 : vector<8x128xf32>
    %c8_i32_57 = arith.constant 8 : i32
    %252 = arith.muli %232, %c8_i32_57 : i32
    %c2_i32_58 = arith.constant 2 : i32
    %253 = arith.addi %252, %c2_i32_58 : i32
    %254 = arith.index_cast %253 : i32 to index
    %255 = memref.load %arg4[%254] : memref<192xf32, #tpu.memory_space<smem>>
    %256 = vector.broadcast %255 : f32 to vector<8x128xf32>
    %257 = arith.subf %209, %256 : vector<8x128xf32>
    %258 = arith.mulf %257, %257 : vector<8x128xf32>
    %259 = arith.addf %251, %258 : vector<8x128xf32>
    %c8_i32_59 = arith.constant 8 : i32
    %260 = arith.muli %232, %c8_i32_59 : i32
    %c3_i32_60 = arith.constant 3 : i32
    %261 = arith.addi %260, %c3_i32_60 : i32
    %262 = arith.index_cast %261 : i32 to index
    %263 = memref.load %arg4[%262] : memref<192xf32, #tpu.memory_space<smem>>
    %264 = vector.broadcast %263 : f32 to vector<8x128xf32>
    %265 = arith.subf %211, %264 : vector<8x128xf32>
    %266 = arith.mulf %265, %265 : vector<8x128xf32>
    %267 = arith.addf %259, %266 : vector<8x128xf32>
    %c8_i32_61 = arith.constant 8 : i32
    %268 = arith.muli %232, %c8_i32_61 : i32
    %c4_i32_62 = arith.constant 4 : i32
    %269 = arith.addi %268, %c4_i32_62 : i32
    %270 = arith.index_cast %269 : i32 to index
    %271 = memref.load %arg4[%270] : memref<192xf32, #tpu.memory_space<smem>>
    %272 = vector.broadcast %271 : f32 to vector<8x128xf32>
    %273 = arith.subf %213, %272 : vector<8x128xf32>
    %274 = arith.mulf %273, %273 : vector<8x128xf32>
    %275 = arith.addf %267, %274 : vector<8x128xf32>
    %c8_i32_63 = arith.constant 8 : i32
    %276 = arith.muli %232, %c8_i32_63 : i32
    %c5_i32_64 = arith.constant 5 : i32
    %277 = arith.addi %276, %c5_i32_64 : i32
    %278 = arith.index_cast %277 : i32 to index
    %279 = memref.load %arg4[%278] : memref<192xf32, #tpu.memory_space<smem>>
    %280 = vector.broadcast %279 : f32 to vector<8x128xf32>
    %281 = arith.subf %215, %280 : vector<8x128xf32>
    %282 = arith.mulf %281, %281 : vector<8x128xf32>
    %283 = arith.addf %275, %282 : vector<8x128xf32>
    %c8_i32_65 = arith.constant 8 : i32
    %284 = arith.muli %232, %c8_i32_65 : i32
    %c6_i32_66 = arith.constant 6 : i32
    %285 = arith.addi %284, %c6_i32_66 : i32
    %286 = arith.index_cast %285 : i32 to index
    %287 = memref.load %arg4[%286] : memref<192xf32, #tpu.memory_space<smem>>
    %288 = vector.broadcast %287 : f32 to vector<8x128xf32>
    %289 = arith.subf %217, %288 : vector<8x128xf32>
    %290 = arith.mulf %289, %289 : vector<8x128xf32>
    %291 = arith.addf %283, %290 : vector<8x128xf32>
    %c8_i32_67 = arith.constant 8 : i32
    %292 = arith.muli %232, %c8_i32_67 : i32
    %c7_i32_68 = arith.constant 7 : i32
    %293 = arith.addi %292, %c7_i32_68 : i32
    %294 = arith.index_cast %293 : i32 to index
    %295 = memref.load %arg4[%294] : memref<192xf32, #tpu.memory_space<smem>>
    %296 = vector.broadcast %295 : f32 to vector<8x128xf32>
    %297 = arith.subf %219, %296 : vector<8x128xf32>
    %298 = arith.mulf %297, %297 : vector<8x128xf32>
    %299 = arith.addf %291, %298 : vector<8x128xf32>
    %300 = math.sqrt %299 : vector<8x128xf32>
    %301 = vector.broadcast %234 : f32 to vector<8x128xf32>
    %302 = arith.addf %301, %300 : vector<8x128xf32>
    %303 = tpu.reciprocal %302 {approx = true} : vector<8x128xf32> -> vector<8x128xf32>
    %304 = arith.mulf %302, %303 : vector<8x128xf32>
    %cst_69 = arith.constant 2.000000e+00 : f32
    %305 = vector.broadcast %cst_69 : f32 to vector<8x128xf32>
    %306 = arith.subf %305, %304 : vector<8x128xf32>
    %307 = arith.mulf %303, %306 : vector<8x128xf32>
    %308 = vector.broadcast %236 : f32 to vector<8x128xf32>
    %309 = arith.mulf %308, %307 : vector<8x128xf32>
    %310 = arith.mulf %309, %242 : vector<8x128xf32>
    %311 = arith.addf %205, %310 : vector<8x128xf32>
    %312 = arith.mulf %309, %249 : vector<8x128xf32>
    %313 = arith.addf %207, %312 : vector<8x128xf32>
    %314 = arith.mulf %309, %257 : vector<8x128xf32>
    %315 = arith.addf %209, %314 : vector<8x128xf32>
    %316 = arith.mulf %309, %265 : vector<8x128xf32>
    %317 = arith.addf %211, %316 : vector<8x128xf32>
    %318 = arith.mulf %309, %273 : vector<8x128xf32>
    %319 = arith.addf %213, %318 : vector<8x128xf32>
    %320 = arith.mulf %309, %281 : vector<8x128xf32>
    %321 = arith.addf %215, %320 : vector<8x128xf32>
    %322 = arith.mulf %309, %289 : vector<8x128xf32>
    %323 = arith.addf %217, %322 : vector<8x128xf32>
    %324 = arith.mulf %309, %297 : vector<8x128xf32>
    %325 = arith.addf %219, %324 : vector<8x128xf32>
    %cst_70 = arith.constant 1.000000e+00 : f32
    %326 = vector.broadcast %cst_70 : f32 to vector<8x128xf32>
    %327 = arith.addf %326, %309 : vector<8x128xf32>
    %328 = math.log %327 : vector<8x128xf32>
    %cst_71 = arith.constant 7.000000e+00 : f32
    %329 = vector.broadcast %cst_71 : f32 to vector<8x128xf32>
    %330 = arith.mulf %329, %328 : vector<8x128xf32>
    %331 = arith.mulf %309, %307 : vector<8x128xf32>
    %332 = arith.mulf %331, %300 : vector<8x128xf32>
    %333 = arith.subf %327, %332 : vector<8x128xf32>
    %334 = math.log %333 : vector<8x128xf32>
    %335 = arith.addf %330, %334 : vector<8x128xf32>
    %336 = arith.addf %230, %335 : vector<8x128xf32>
    %c6_i32_72 = arith.constant 6 : i32
    %337 = arith.muli %1, %c6_i32_72 : i32
    %c3_i32_73 = arith.constant 3 : i32
    %338 = arith.addi %337, %c3_i32_73 : i32
    %339 = arith.index_cast %338 : i32 to index
    %340 = memref.load %arg2[%339] : memref<24xf32, #tpu.memory_space<smem>>
    %341 = arith.index_cast %338 : i32 to index
    %342 = memref.load %arg3[%341] : memref<24xf32, #tpu.memory_space<smem>>
    %c8_i32_74 = arith.constant 8 : i32
    %343 = arith.muli %338, %c8_i32_74 : i32
    %c0_i32_75 = arith.constant 0 : i32
    %344 = arith.addi %343, %c0_i32_75 : i32
    %345 = arith.index_cast %344 : i32 to index
    %346 = memref.load %arg4[%345] : memref<192xf32, #tpu.memory_space<smem>>
    %347 = vector.broadcast %346 : f32 to vector<8x128xf32>
    %348 = arith.subf %311, %347 : vector<8x128xf32>
    %349 = arith.mulf %348, %348 : vector<8x128xf32>
    %c8_i32_76 = arith.constant 8 : i32
    %350 = arith.muli %338, %c8_i32_76 : i32
    %c1_i32_77 = arith.constant 1 : i32
    %351 = arith.addi %350, %c1_i32_77 : i32
    %352 = arith.index_cast %351 : i32 to index
    %353 = memref.load %arg4[%352] : memref<192xf32, #tpu.memory_space<smem>>
    %354 = vector.broadcast %353 : f32 to vector<8x128xf32>
    %355 = arith.subf %313, %354 : vector<8x128xf32>
    %356 = arith.mulf %355, %355 : vector<8x128xf32>
    %357 = arith.addf %349, %356 : vector<8x128xf32>
    %c8_i32_78 = arith.constant 8 : i32
    %358 = arith.muli %338, %c8_i32_78 : i32
    %c2_i32_79 = arith.constant 2 : i32
    %359 = arith.addi %358, %c2_i32_79 : i32
    %360 = arith.index_cast %359 : i32 to index
    %361 = memref.load %arg4[%360] : memref<192xf32, #tpu.memory_space<smem>>
    %362 = vector.broadcast %361 : f32 to vector<8x128xf32>
    %363 = arith.subf %315, %362 : vector<8x128xf32>
    %364 = arith.mulf %363, %363 : vector<8x128xf32>
    %365 = arith.addf %357, %364 : vector<8x128xf32>
    %c8_i32_80 = arith.constant 8 : i32
    %366 = arith.muli %338, %c8_i32_80 : i32
    %c3_i32_81 = arith.constant 3 : i32
    %367 = arith.addi %366, %c3_i32_81 : i32
    %368 = arith.index_cast %367 : i32 to index
    %369 = memref.load %arg4[%368] : memref<192xf32, #tpu.memory_space<smem>>
    %370 = vector.broadcast %369 : f32 to vector<8x128xf32>
    %371 = arith.subf %317, %370 : vector<8x128xf32>
    %372 = arith.mulf %371, %371 : vector<8x128xf32>
    %373 = arith.addf %365, %372 : vector<8x128xf32>
    %c8_i32_82 = arith.constant 8 : i32
    %374 = arith.muli %338, %c8_i32_82 : i32
    %c4_i32_83 = arith.constant 4 : i32
    %375 = arith.addi %374, %c4_i32_83 : i32
    %376 = arith.index_cast %375 : i32 to index
    %377 = memref.load %arg4[%376] : memref<192xf32, #tpu.memory_space<smem>>
    %378 = vector.broadcast %377 : f32 to vector<8x128xf32>
    %379 = arith.subf %319, %378 : vector<8x128xf32>
    %380 = arith.mulf %379, %379 : vector<8x128xf32>
    %381 = arith.addf %373, %380 : vector<8x128xf32>
    %c8_i32_84 = arith.constant 8 : i32
    %382 = arith.muli %338, %c8_i32_84 : i32
    %c5_i32_85 = arith.constant 5 : i32
    %383 = arith.addi %382, %c5_i32_85 : i32
    %384 = arith.index_cast %383 : i32 to index
    %385 = memref.load %arg4[%384] : memref<192xf32, #tpu.memory_space<smem>>
    %386 = vector.broadcast %385 : f32 to vector<8x128xf32>
    %387 = arith.subf %321, %386 : vector<8x128xf32>
    %388 = arith.mulf %387, %387 : vector<8x128xf32>
    %389 = arith.addf %381, %388 : vector<8x128xf32>
    %c8_i32_86 = arith.constant 8 : i32
    %390 = arith.muli %338, %c8_i32_86 : i32
    %c6_i32_87 = arith.constant 6 : i32
    %391 = arith.addi %390, %c6_i32_87 : i32
    %392 = arith.index_cast %391 : i32 to index
    %393 = memref.load %arg4[%392] : memref<192xf32, #tpu.memory_space<smem>>
    %394 = vector.broadcast %393 : f32 to vector<8x128xf32>
    %395 = arith.subf %323, %394 : vector<8x128xf32>
    %396 = arith.mulf %395, %395 : vector<8x128xf32>
    %397 = arith.addf %389, %396 : vector<8x128xf32>
    %c8_i32_88 = arith.constant 8 : i32
    %398 = arith.muli %338, %c8_i32_88 : i32
    %c7_i32_89 = arith.constant 7 : i32
    %399 = arith.addi %398, %c7_i32_89 : i32
    %400 = arith.index_cast %399 : i32 to index
    %401 = memref.load %arg4[%400] : memref<192xf32, #tpu.memory_space<smem>>
    %402 = vector.broadcast %401 : f32 to vector<8x128xf32>
    %403 = arith.subf %325, %402 : vector<8x128xf32>
    %404 = arith.mulf %403, %403 : vector<8x128xf32>
    %405 = arith.addf %397, %404 : vector<8x128xf32>
    %406 = math.sqrt %405 : vector<8x128xf32>
    %407 = vector.broadcast %340 : f32 to vector<8x128xf32>
    %408 = arith.addf %407, %406 : vector<8x128xf32>
    %409 = tpu.reciprocal %408 {approx = true} : vector<8x128xf32> -> vector<8x128xf32>
    %410 = arith.mulf %408, %409 : vector<8x128xf32>
    %cst_90 = arith.constant 2.000000e+00 : f32
    %411 = vector.broadcast %cst_90 : f32 to vector<8x128xf32>
    %412 = arith.subf %411, %410 : vector<8x128xf32>
    %413 = arith.mulf %409, %412 : vector<8x128xf32>
    %414 = vector.broadcast %342 : f32 to vector<8x128xf32>
    %415 = arith.mulf %414, %413 : vector<8x128xf32>
    %416 = arith.mulf %415, %348 : vector<8x128xf32>
    %417 = arith.addf %311, %416 : vector<8x128xf32>
    %418 = arith.mulf %415, %355 : vector<8x128xf32>
    %419 = arith.addf %313, %418 : vector<8x128xf32>
    %420 = arith.mulf %415, %363 : vector<8x128xf32>
    %421 = arith.addf %315, %420 : vector<8x128xf32>
    %422 = arith.mulf %415, %371 : vector<8x128xf32>
    %423 = arith.addf %317, %422 : vector<8x128xf32>
    %424 = arith.mulf %415, %379 : vector<8x128xf32>
    %425 = arith.addf %319, %424 : vector<8x128xf32>
    %426 = arith.mulf %415, %387 : vector<8x128xf32>
    %427 = arith.addf %321, %426 : vector<8x128xf32>
    %428 = arith.mulf %415, %395 : vector<8x128xf32>
    %429 = arith.addf %323, %428 : vector<8x128xf32>
    %430 = arith.mulf %415, %403 : vector<8x128xf32>
    %431 = arith.addf %325, %430 : vector<8x128xf32>
    %cst_91 = arith.constant 1.000000e+00 : f32
    %432 = vector.broadcast %cst_91 : f32 to vector<8x128xf32>
    %433 = arith.addf %432, %415 : vector<8x128xf32>
    %434 = math.log %433 : vector<8x128xf32>
    %cst_92 = arith.constant 7.000000e+00 : f32
    %435 = vector.broadcast %cst_92 : f32 to vector<8x128xf32>
    %436 = arith.mulf %435, %434 : vector<8x128xf32>
    %437 = arith.mulf %415, %413 : vector<8x128xf32>
    %438 = arith.mulf %437, %406 : vector<8x128xf32>
    %439 = arith.subf %433, %438 : vector<8x128xf32>
    %440 = math.log %439 : vector<8x128xf32>
    %441 = arith.addf %436, %440 : vector<8x128xf32>
    %442 = arith.addf %336, %441 : vector<8x128xf32>
    %c6_i32_93 = arith.constant 6 : i32
    %443 = arith.muli %1, %c6_i32_93 : i32
    %c4_i32_94 = arith.constant 4 : i32
    %444 = arith.addi %443, %c4_i32_94 : i32
    %445 = arith.index_cast %444 : i32 to index
    %446 = memref.load %arg2[%445] : memref<24xf32, #tpu.memory_space<smem>>
    %447 = arith.index_cast %444 : i32 to index
    %448 = memref.load %arg3[%447] : memref<24xf32, #tpu.memory_space<smem>>
    %c8_i32_95 = arith.constant 8 : i32
    %449 = arith.muli %444, %c8_i32_95 : i32
    %c0_i32_96 = arith.constant 0 : i32
    %450 = arith.addi %449, %c0_i32_96 : i32
    %451 = arith.index_cast %450 : i32 to index
    %452 = memref.load %arg4[%451] : memref<192xf32, #tpu.memory_space<smem>>
    %453 = vector.broadcast %452 : f32 to vector<8x128xf32>
    %454 = arith.subf %417, %453 : vector<8x128xf32>
    %455 = arith.mulf %454, %454 : vector<8x128xf32>
    %c8_i32_97 = arith.constant 8 : i32
    %456 = arith.muli %444, %c8_i32_97 : i32
    %c1_i32_98 = arith.constant 1 : i32
    %457 = arith.addi %456, %c1_i32_98 : i32
    %458 = arith.index_cast %457 : i32 to index
    %459 = memref.load %arg4[%458] : memref<192xf32, #tpu.memory_space<smem>>
    %460 = vector.broadcast %459 : f32 to vector<8x128xf32>
    %461 = arith.subf %419, %460 : vector<8x128xf32>
    %462 = arith.mulf %461, %461 : vector<8x128xf32>
    %463 = arith.addf %455, %462 : vector<8x128xf32>
    %c8_i32_99 = arith.constant 8 : i32
    %464 = arith.muli %444, %c8_i32_99 : i32
    %c2_i32_100 = arith.constant 2 : i32
    %465 = arith.addi %464, %c2_i32_100 : i32
    %466 = arith.index_cast %465 : i32 to index
    %467 = memref.load %arg4[%466] : memref<192xf32, #tpu.memory_space<smem>>
    %468 = vector.broadcast %467 : f32 to vector<8x128xf32>
    %469 = arith.subf %421, %468 : vector<8x128xf32>
    %470 = arith.mulf %469, %469 : vector<8x128xf32>
    %471 = arith.addf %463, %470 : vector<8x128xf32>
    %c8_i32_101 = arith.constant 8 : i32
    %472 = arith.muli %444, %c8_i32_101 : i32
    %c3_i32_102 = arith.constant 3 : i32
    %473 = arith.addi %472, %c3_i32_102 : i32
    %474 = arith.index_cast %473 : i32 to index
    %475 = memref.load %arg4[%474] : memref<192xf32, #tpu.memory_space<smem>>
    %476 = vector.broadcast %475 : f32 to vector<8x128xf32>
    %477 = arith.subf %423, %476 : vector<8x128xf32>
    %478 = arith.mulf %477, %477 : vector<8x128xf32>
    %479 = arith.addf %471, %478 : vector<8x128xf32>
    %c8_i32_103 = arith.constant 8 : i32
    %480 = arith.muli %444, %c8_i32_103 : i32
    %c4_i32_104 = arith.constant 4 : i32
    %481 = arith.addi %480, %c4_i32_104 : i32
    %482 = arith.index_cast %481 : i32 to index
    %483 = memref.load %arg4[%482] : memref<192xf32, #tpu.memory_space<smem>>
    %484 = vector.broadcast %483 : f32 to vector<8x128xf32>
    %485 = arith.subf %425, %484 : vector<8x128xf32>
    %486 = arith.mulf %485, %485 : vector<8x128xf32>
    %487 = arith.addf %479, %486 : vector<8x128xf32>
    %c8_i32_105 = arith.constant 8 : i32
    %488 = arith.muli %444, %c8_i32_105 : i32
    %c5_i32_106 = arith.constant 5 : i32
    %489 = arith.addi %488, %c5_i32_106 : i32
    %490 = arith.index_cast %489 : i32 to index
    %491 = memref.load %arg4[%490] : memref<192xf32, #tpu.memory_space<smem>>
    %492 = vector.broadcast %491 : f32 to vector<8x128xf32>
    %493 = arith.subf %427, %492 : vector<8x128xf32>
    %494 = arith.mulf %493, %493 : vector<8x128xf32>
    %495 = arith.addf %487, %494 : vector<8x128xf32>
    %c8_i32_107 = arith.constant 8 : i32
    %496 = arith.muli %444, %c8_i32_107 : i32
    %c6_i32_108 = arith.constant 6 : i32
    %497 = arith.addi %496, %c6_i32_108 : i32
    %498 = arith.index_cast %497 : i32 to index
    %499 = memref.load %arg4[%498] : memref<192xf32, #tpu.memory_space<smem>>
    %500 = vector.broadcast %499 : f32 to vector<8x128xf32>
    %501 = arith.subf %429, %500 : vector<8x128xf32>
    %502 = arith.mulf %501, %501 : vector<8x128xf32>
    %503 = arith.addf %495, %502 : vector<8x128xf32>
    %c8_i32_109 = arith.constant 8 : i32
    %504 = arith.muli %444, %c8_i32_109 : i32
    %c7_i32_110 = arith.constant 7 : i32
    %505 = arith.addi %504, %c7_i32_110 : i32
    %506 = arith.index_cast %505 : i32 to index
    %507 = memref.load %arg4[%506] : memref<192xf32, #tpu.memory_space<smem>>
    %508 = vector.broadcast %507 : f32 to vector<8x128xf32>
    %509 = arith.subf %431, %508 : vector<8x128xf32>
    %510 = arith.mulf %509, %509 : vector<8x128xf32>
    %511 = arith.addf %503, %510 : vector<8x128xf32>
    %512 = math.sqrt %511 : vector<8x128xf32>
    %513 = vector.broadcast %446 : f32 to vector<8x128xf32>
    %514 = arith.addf %513, %512 : vector<8x128xf32>
    %515 = tpu.reciprocal %514 {approx = true} : vector<8x128xf32> -> vector<8x128xf32>
    %516 = arith.mulf %514, %515 : vector<8x128xf32>
    %cst_111 = arith.constant 2.000000e+00 : f32
    %517 = vector.broadcast %cst_111 : f32 to vector<8x128xf32>
    %518 = arith.subf %517, %516 : vector<8x128xf32>
    %519 = arith.mulf %515, %518 : vector<8x128xf32>
    %520 = vector.broadcast %448 : f32 to vector<8x128xf32>
    %521 = arith.mulf %520, %519 : vector<8x128xf32>
    %522 = arith.mulf %521, %454 : vector<8x128xf32>
    %523 = arith.addf %417, %522 : vector<8x128xf32>
    %524 = arith.mulf %521, %461 : vector<8x128xf32>
    %525 = arith.addf %419, %524 : vector<8x128xf32>
    %526 = arith.mulf %521, %469 : vector<8x128xf32>
    %527 = arith.addf %421, %526 : vector<8x128xf32>
    %528 = arith.mulf %521, %477 : vector<8x128xf32>
    %529 = arith.addf %423, %528 : vector<8x128xf32>
    %530 = arith.mulf %521, %485 : vector<8x128xf32>
    %531 = arith.addf %425, %530 : vector<8x128xf32>
    %532 = arith.mulf %521, %493 : vector<8x128xf32>
    %533 = arith.addf %427, %532 : vector<8x128xf32>
    %534 = arith.mulf %521, %501 : vector<8x128xf32>
    %535 = arith.addf %429, %534 : vector<8x128xf32>
    %536 = arith.mulf %521, %509 : vector<8x128xf32>
    %537 = arith.addf %431, %536 : vector<8x128xf32>
    %cst_112 = arith.constant 1.000000e+00 : f32
    %538 = vector.broadcast %cst_112 : f32 to vector<8x128xf32>
    %539 = arith.addf %538, %521 : vector<8x128xf32>
    %540 = math.log %539 : vector<8x128xf32>
    %cst_113 = arith.constant 7.000000e+00 : f32
    %541 = vector.broadcast %cst_113 : f32 to vector<8x128xf32>
    %542 = arith.mulf %541, %540 : vector<8x128xf32>
    %543 = arith.mulf %521, %519 : vector<8x128xf32>
    %544 = arith.mulf %543, %512 : vector<8x128xf32>
    %545 = arith.subf %539, %544 : vector<8x128xf32>
    %546 = math.log %545 : vector<8x128xf32>
    %547 = arith.addf %542, %546 : vector<8x128xf32>
    %548 = arith.addf %442, %547 : vector<8x128xf32>
    %c6_i32_114 = arith.constant 6 : i32
    %549 = arith.muli %1, %c6_i32_114 : i32
    %c5_i32_115 = arith.constant 5 : i32
    %550 = arith.addi %549, %c5_i32_115 : i32
    %551 = arith.index_cast %550 : i32 to index
    %552 = memref.load %arg2[%551] : memref<24xf32, #tpu.memory_space<smem>>
    %553 = arith.index_cast %550 : i32 to index
    %554 = memref.load %arg3[%553] : memref<24xf32, #tpu.memory_space<smem>>
    %c8_i32_116 = arith.constant 8 : i32
    %555 = arith.muli %550, %c8_i32_116 : i32
    %c0_i32_117 = arith.constant 0 : i32
    %556 = arith.addi %555, %c0_i32_117 : i32
    %557 = arith.index_cast %556 : i32 to index
    %558 = memref.load %arg4[%557] : memref<192xf32, #tpu.memory_space<smem>>
    %559 = vector.broadcast %558 : f32 to vector<8x128xf32>
    %560 = arith.subf %523, %559 : vector<8x128xf32>
    %561 = arith.mulf %560, %560 : vector<8x128xf32>
    %c8_i32_118 = arith.constant 8 : i32
    %562 = arith.muli %550, %c8_i32_118 : i32
    %c1_i32_119 = arith.constant 1 : i32
    %563 = arith.addi %562, %c1_i32_119 : i32
    %564 = arith.index_cast %563 : i32 to index
    %565 = memref.load %arg4[%564] : memref<192xf32, #tpu.memory_space<smem>>
    %566 = vector.broadcast %565 : f32 to vector<8x128xf32>
    %567 = arith.subf %525, %566 : vector<8x128xf32>
    %568 = arith.mulf %567, %567 : vector<8x128xf32>
    %569 = arith.addf %561, %568 : vector<8x128xf32>
    %c8_i32_120 = arith.constant 8 : i32
    %570 = arith.muli %550, %c8_i32_120 : i32
    %c2_i32_121 = arith.constant 2 : i32
    %571 = arith.addi %570, %c2_i32_121 : i32
    %572 = arith.index_cast %571 : i32 to index
    %573 = memref.load %arg4[%572] : memref<192xf32, #tpu.memory_space<smem>>
    %574 = vector.broadcast %573 : f32 to vector<8x128xf32>
    %575 = arith.subf %527, %574 : vector<8x128xf32>
    %576 = arith.mulf %575, %575 : vector<8x128xf32>
    %577 = arith.addf %569, %576 : vector<8x128xf32>
    %c8_i32_122 = arith.constant 8 : i32
    %578 = arith.muli %550, %c8_i32_122 : i32
    %c3_i32_123 = arith.constant 3 : i32
    %579 = arith.addi %578, %c3_i32_123 : i32
    %580 = arith.index_cast %579 : i32 to index
    %581 = memref.load %arg4[%580] : memref<192xf32, #tpu.memory_space<smem>>
    %582 = vector.broadcast %581 : f32 to vector<8x128xf32>
    %583 = arith.subf %529, %582 : vector<8x128xf32>
    %584 = arith.mulf %583, %583 : vector<8x128xf32>
    %585 = arith.addf %577, %584 : vector<8x128xf32>
    %c8_i32_124 = arith.constant 8 : i32
    %586 = arith.muli %550, %c8_i32_124 : i32
    %c4_i32_125 = arith.constant 4 : i32
    %587 = arith.addi %586, %c4_i32_125 : i32
    %588 = arith.index_cast %587 : i32 to index
    %589 = memref.load %arg4[%588] : memref<192xf32, #tpu.memory_space<smem>>
    %590 = vector.broadcast %589 : f32 to vector<8x128xf32>
    %591 = arith.subf %531, %590 : vector<8x128xf32>
    %592 = arith.mulf %591, %591 : vector<8x128xf32>
    %593 = arith.addf %585, %592 : vector<8x128xf32>
    %c8_i32_126 = arith.constant 8 : i32
    %594 = arith.muli %550, %c8_i32_126 : i32
    %c5_i32_127 = arith.constant 5 : i32
    %595 = arith.addi %594, %c5_i32_127 : i32
    %596 = arith.index_cast %595 : i32 to index
    %597 = memref.load %arg4[%596] : memref<192xf32, #tpu.memory_space<smem>>
    %598 = vector.broadcast %597 : f32 to vector<8x128xf32>
    %599 = arith.subf %533, %598 : vector<8x128xf32>
    %600 = arith.mulf %599, %599 : vector<8x128xf32>
    %601 = arith.addf %593, %600 : vector<8x128xf32>
    %c8_i32_128 = arith.constant 8 : i32
    %602 = arith.muli %550, %c8_i32_128 : i32
    %c6_i32_129 = arith.constant 6 : i32
    %603 = arith.addi %602, %c6_i32_129 : i32
    %604 = arith.index_cast %603 : i32 to index
    %605 = memref.load %arg4[%604] : memref<192xf32, #tpu.memory_space<smem>>
    %606 = vector.broadcast %605 : f32 to vector<8x128xf32>
    %607 = arith.subf %535, %606 : vector<8x128xf32>
    %608 = arith.mulf %607, %607 : vector<8x128xf32>
    %609 = arith.addf %601, %608 : vector<8x128xf32>
    %c8_i32_130 = arith.constant 8 : i32
    %610 = arith.muli %550, %c8_i32_130 : i32
    %c7_i32_131 = arith.constant 7 : i32
    %611 = arith.addi %610, %c7_i32_131 : i32
    %612 = arith.index_cast %611 : i32 to index
    %613 = memref.load %arg4[%612] : memref<192xf32, #tpu.memory_space<smem>>
    %614 = vector.broadcast %613 : f32 to vector<8x128xf32>
    %615 = arith.subf %537, %614 : vector<8x128xf32>
    %616 = arith.mulf %615, %615 : vector<8x128xf32>
    %617 = arith.addf %609, %616 : vector<8x128xf32>
    %618 = math.sqrt %617 : vector<8x128xf32>
    %619 = vector.broadcast %552 : f32 to vector<8x128xf32>
    %620 = arith.addf %619, %618 : vector<8x128xf32>
    %621 = tpu.reciprocal %620 {approx = true} : vector<8x128xf32> -> vector<8x128xf32>
    %622 = arith.mulf %620, %621 : vector<8x128xf32>
    %cst_132 = arith.constant 2.000000e+00 : f32
    %623 = vector.broadcast %cst_132 : f32 to vector<8x128xf32>
    %624 = arith.subf %623, %622 : vector<8x128xf32>
    %625 = arith.mulf %621, %624 : vector<8x128xf32>
    %626 = vector.broadcast %554 : f32 to vector<8x128xf32>
    %627 = arith.mulf %626, %625 : vector<8x128xf32>
    %628 = arith.mulf %627, %560 : vector<8x128xf32>
    %629 = arith.addf %523, %628 : vector<8x128xf32>
    %630 = arith.mulf %627, %567 : vector<8x128xf32>
    %631 = arith.addf %525, %630 : vector<8x128xf32>
    %632 = arith.mulf %627, %575 : vector<8x128xf32>
    %633 = arith.addf %527, %632 : vector<8x128xf32>
    %634 = arith.mulf %627, %583 : vector<8x128xf32>
    %635 = arith.addf %529, %634 : vector<8x128xf32>
    %636 = arith.mulf %627, %591 : vector<8x128xf32>
    %637 = arith.addf %531, %636 : vector<8x128xf32>
    %638 = arith.mulf %627, %599 : vector<8x128xf32>
    %639 = arith.addf %533, %638 : vector<8x128xf32>
    %640 = arith.mulf %627, %607 : vector<8x128xf32>
    %641 = arith.addf %535, %640 : vector<8x128xf32>
    %642 = arith.mulf %627, %615 : vector<8x128xf32>
    %643 = arith.addf %537, %642 : vector<8x128xf32>
    %cst_133 = arith.constant 1.000000e+00 : f32
    %644 = vector.broadcast %cst_133 : f32 to vector<8x128xf32>
    %645 = arith.addf %644, %627 : vector<8x128xf32>
    %646 = math.log %645 : vector<8x128xf32>
    %cst_134 = arith.constant 7.000000e+00 : f32
    %647 = vector.broadcast %cst_134 : f32 to vector<8x128xf32>
    %648 = arith.mulf %647, %646 : vector<8x128xf32>
    %649 = arith.mulf %627, %625 : vector<8x128xf32>
    %650 = arith.mulf %649, %618 : vector<8x128xf32>
    %651 = arith.subf %645, %650 : vector<8x128xf32>
    %652 = math.log %651 : vector<8x128xf32>
    %653 = arith.addf %648, %652 : vector<8x128xf32>
    %654 = arith.addf %548, %653 : vector<8x128xf32>
    %c0_135 = arith.constant 0 : index
    %c0_136 = arith.constant 0 : index
    %c0_137 = arith.constant 0 : index
    %c0_138 = arith.constant 0 : index
    %655 = vector.load %arg6[%c0_135, %c0_136, %c0_137, %c0_138] : memref<1x8x8x128xf32, #tpu.memory_space<vmem>>, vector<1x1x8x128xf32>
    %656 = vector.shape_cast %655 : vector<1x1x8x128xf32> to vector<8x128xf32>
    %657 = vector.shape_cast %629 : vector<8x128xf32> to vector<1x1x8x128xf32>
    tpu.vector_store %arg6[%c0_135, %c0_136, %c0_137, %c0_138], %657 {strides = array<i32>} : memref<1x8x8x128xf32, #tpu.memory_space<vmem>>, vector<1x1x8x128xf32>,
    %c0_139 = arith.constant 0 : index
    %c1_140 = arith.constant 1 : index
    %c0_141 = arith.constant 0 : index
    %c0_142 = arith.constant 0 : index
    %658 = vector.load %arg6[%c0_139, %c1_140, %c0_141, %c0_142] : memref<1x8x8x128xf32, #tpu.memory_space<vmem>>, vector<1x1x8x128xf32>
    %659 = vector.shape_cast %658 : vector<1x1x8x128xf32> to vector<8x128xf32>
    %660 = vector.shape_cast %631 : vector<8x128xf32> to vector<1x1x8x128xf32>
    tpu.vector_store %arg6[%c0_139, %c1_140, %c0_141, %c0_142], %660 {strides = array<i32>} : memref<1x8x8x128xf32, #tpu.memory_space<vmem>>, vector<1x1x8x128xf32>,
    %c0_143 = arith.constant 0 : index
    %c2_144 = arith.constant 2 : index
    %c0_145 = arith.constant 0 : index
    %c0_146 = arith.constant 0 : index
    %661 = vector.load %arg6[%c0_143, %c2_144, %c0_145, %c0_146] : memref<1x8x8x128xf32, #tpu.memory_space<vmem>>, vector<1x1x8x128xf32>
    %662 = vector.shape_cast %661 : vector<1x1x8x128xf32> to vector<8x128xf32>
    %663 = vector.shape_cast %633 : vector<8x128xf32> to vector<1x1x8x128xf32>
    tpu.vector_store %arg6[%c0_143, %c2_144, %c0_145, %c0_146], %663 {strides = array<i32>} : memref<1x8x8x128xf32, #tpu.memory_space<vmem>>, vector<1x1x8x128xf32>,
    %c0_147 = arith.constant 0 : index
    %c3_148 = arith.constant 3 : index
    %c0_149 = arith.constant 0 : index
    %c0_150 = arith.constant 0 : index
    %664 = vector.load %arg6[%c0_147, %c3_148, %c0_149, %c0_150] : memref<1x8x8x128xf32, #tpu.memory_space<vmem>>, vector<1x1x8x128xf32>
    %665 = vector.shape_cast %664 : vector<1x1x8x128xf32> to vector<8x128xf32>
    %666 = vector.shape_cast %635 : vector<8x128xf32> to vector<1x1x8x128xf32>
    tpu.vector_store %arg6[%c0_147, %c3_148, %c0_149, %c0_150], %666 {strides = array<i32>} : memref<1x8x8x128xf32, #tpu.memory_space<vmem>>, vector<1x1x8x128xf32>,
    %c0_151 = arith.constant 0 : index
    %c4_152 = arith.constant 4 : index
    %c0_153 = arith.constant 0 : index
    %c0_154 = arith.constant 0 : index
    %667 = vector.load %arg6[%c0_151, %c4_152, %c0_153, %c0_154] : memref<1x8x8x128xf32, #tpu.memory_space<vmem>>, vector<1x1x8x128xf32>
    %668 = vector.shape_cast %667 : vector<1x1x8x128xf32> to vector<8x128xf32>
    %669 = vector.shape_cast %637 : vector<8x128xf32> to vector<1x1x8x128xf32>
    tpu.vector_store %arg6[%c0_151, %c4_152, %c0_153, %c0_154], %669 {strides = array<i32>} : memref<1x8x8x128xf32, #tpu.memory_space<vmem>>, vector<1x1x8x128xf32>,
    %c0_155 = arith.constant 0 : index
    %c5_156 = arith.constant 5 : index
    %c0_157 = arith.constant 0 : index
    %c0_158 = arith.constant 0 : index
    %670 = vector.load %arg6[%c0_155, %c5_156, %c0_157, %c0_158] : memref<1x8x8x128xf32, #tpu.memory_space<vmem>>, vector<1x1x8x128xf32>
    %671 = vector.shape_cast %670 : vector<1x1x8x128xf32> to vector<8x128xf32>
    %672 = vector.shape_cast %639 : vector<8x128xf32> to vector<1x1x8x128xf32>
    tpu.vector_store %arg6[%c0_155, %c5_156, %c0_157, %c0_158], %672 {strides = array<i32>} : memref<1x8x8x128xf32, #tpu.memory_space<vmem>>, vector<1x1x8x128xf32>,
    %c0_159 = arith.constant 0 : index
    %c6_160 = arith.constant 6 : index
    %c0_161 = arith.constant 0 : index
    %c0_162 = arith.constant 0 : index
    %673 = vector.load %arg6[%c0_159, %c6_160, %c0_161, %c0_162] : memref<1x8x8x128xf32, #tpu.memory_space<vmem>>, vector<1x1x8x128xf32>
    %674 = vector.shape_cast %673 : vector<1x1x8x128xf32> to vector<8x128xf32>
    %675 = vector.shape_cast %641 : vector<8x128xf32> to vector<1x1x8x128xf32>
    tpu.vector_store %arg6[%c0_159, %c6_160, %c0_161, %c0_162], %675 {strides = array<i32>} : memref<1x8x8x128xf32, #tpu.memory_space<vmem>>, vector<1x1x8x128xf32>,
    %c0_163 = arith.constant 0 : index
    %c7_164 = arith.constant 7 : index
    %c0_165 = arith.constant 0 : index
    %c0_166 = arith.constant 0 : index
    %676 = vector.load %arg6[%c0_163, %c7_164, %c0_165, %c0_166] : memref<1x8x8x128xf32, #tpu.memory_space<vmem>>, vector<1x1x8x128xf32>
    %677 = vector.shape_cast %676 : vector<1x1x8x128xf32> to vector<8x128xf32>
    %678 = vector.shape_cast %643 : vector<8x128xf32> to vector<1x1x8x128xf32>
    tpu.vector_store %arg6[%c0_163, %c7_164, %c0_165, %c0_166], %678 {strides = array<i32>} : memref<1x8x8x128xf32, #tpu.memory_space<vmem>>, vector<1x1x8x128xf32>,
    %c0_167 = arith.constant 0 : index
    %c0_168 = arith.constant 0 : index
    %c0_169 = arith.constant 0 : index
    %679 = vector.load %arg7[%c0_167, %c0_168, %c0_169] : memref<1x8x128xf32, #tpu.memory_space<vmem>>, vector<1x8x128xf32>
    %680 = vector.shape_cast %679 : vector<1x8x128xf32> to vector<8x128xf32>
    %681 = vector.shape_cast %654 : vector<8x128xf32> to vector<1x8x128xf32>
    tpu.vector_store %arg7[%c0_167, %c0_168, %c0_169], %681 {strides = array<i32>} : memref<1x8x128xf32, #tpu.memory_space<vmem>>, vector<1x8x128xf32>,
    return
  }
  func.func @transform_0(%arg0: i32, %arg1: i32) -> i32 {
    %c0_i32 = arith.constant 0 : i32
    %c0_i32_0 = arith.constant 0 : i32
    return %c0_i32 : i32
  }
  func.func @transform_1(%arg0: i32, %arg1: i32) -> i32 {
    %c0_i32 = arith.constant 0 : i32
    %c0_i32_0 = arith.constant 0 : i32
    return %c0_i32 : i32
  }
  func.func @transform_2(%arg0: i32, %arg1: i32) -> i32 {
    %c0_i32 = arith.constant 0 : i32
    %c0_i32_0 = arith.constant 0 : i32
    return %c0_i32 : i32
  }
  func.func @transform_3(%arg0: i32, %arg1: i32) -> (i32, i32, i32) {
    %c0_i32 = arith.constant 0 : i32
    %c0_i32_0 = arith.constant 0 : i32
    %c0_i32_1 = arith.constant 0 : i32
    return %c0_i32, %arg1, %c0_i32_0 : i32, i32, i32
  }
  func.func @transform_4(%arg0: i32, %arg1: i32) -> (i32, i32, i32, i32) {
    %c0_i32 = arith.constant 0 : i32
    %c0_i32_0 = arith.constant 0 : i32
    %c0_i32_1 = arith.constant 0 : i32
    return %arg0, %c0_i32, %arg1, %c0_i32_0 : i32, i32, i32, i32
  }
  func.func @transform_5(%arg0: i32, %arg1: i32) -> (i32, i32, i32) {
    %c0_i32 = arith.constant 0 : i32
    %c0_i32_0 = arith.constant 0 : i32
    return %arg0, %arg1, %c0_i32 : i32, i32, i32
  }
}

</mosaic_0001>

<bundles_post_ra>
// kernel: tpu_custom_call.1
= control target key start
LH: loop header
LB: loop body
LE: loop exit
PB: predicated region body
PF: predicated region fallthrough
CT: control target
= control target key end

     0   :  { %11 = vsyncpa [#allocation5], 0  ;;  %s2298_s0 = inlined_call_operand.hbm [shape: f32[24], index: 0, kind: input, shape index: {}]   ;;  %s2299_s1 = inlined_call_operand.vmem [shape: f32[24], index: 1, kind: input, shape index: {}]   ;;  %s2300_s2 = inlined_call_operand.vmem [shape: f32[192], index: 2, kind: input, shape index: {}]   ;;  %s2301_s3 = inlined_call_operand.hbm [shape: f32[8,8,128], index: 3, kind: input, shape index: {}]   ;;  %s2302_s4 = inlined_call_operand.hbm [shape: f32[4,8,8,128], index: 4, kind: output, shape index: {0}]   ;;  %s2303_s5 = inlined_call_operand.hbm [shape: f32[4,8,128], index: 5, kind: output, shape index: {1}]  }
   0x1   :  { %12 = vsyncpa [#allocation6], 0 }
   0x2   :  { %13 = vsyncpa [#allocation9], 0 }
   0x3   :  { %14 = vsyncpa [#allocation3], 0 }
   0x4   :  { %15 = vsyncpa [#allocation4], 0 }
   0x5   :  { %17 = vsyncpa [#allocation4 + $0x1], 0 }
   0x6   :  { %18 = vsyncpa [#allocation13], 0 }
   0x7   :  { %20 = vsyncpa [#allocation13 + $0x1], 0  ;;  %s1481_s18 = smov 0   ;;  %s1483_s19 = smov 0  }
   0x8   :  { %s1485_s20 = smov 0   ;;  %s1487_s21 = smov 0  }
   0x9   :  { %s1489_s22 = smov 0   ;;  %s1491_s23 = smov 0  }
   0xa LB: > { %s1048_s24 = sadd.s32 4294967295, %s1439_s23   ;;  %s1049_s25 = sadd.s32 4294967294, %s1439_s23   ;;  %s1439_s23 = sphi %s1491_s23, %s26_s23   ;;  %s1435_s22 = sphi %s1489_s22, %s2321_s22   ;;  %s1431_s21 = sphi %s1487_s21, %s2320_s21   ;;  %s1427_s20 = sphi %s1485_s20, %s2319_s20   ;;  %s1423_s19 = sphi %s1483_s19, %s2318_s19   ;;  %s1419_s18 = sphi %s1481_s18, %s2317_s18  }
   0xb   : > { %s38_s26 = sadd.s32 1, %s1435_s22  ;;  %s136_s27 = sadd.s32 1, %s1427_s20 }
   0xc   : > { %p40_p0 = scmp.ge.s32.totalorder %s38_s26, 4  ;;  %p146_p1 = scmp.ne.s32.totalorder %s1427_s20, %s1423_s19 }
   0xd   : > { %p147_p2 = scmp.eq.s32.totalorder %s1048_s24, 3  ;;  %p152_p3 = scmp.ne.s32.totalorder %s1423_s19, %s1419_s18 }
   0xe   : > { %s2323_s26 = smov (%p40_p0, %s38_s26), 0  ;;  %p153_p5 = scmp.eq.s32.totalorder %s1049_s25, 3 }
   0xf   : > { %p1521_p4 = por %p147_p2, %p146_p1  ;;  %s131_s29 = ssub.s32 %s1435_s22, %s2323_s26 }
  0x10   : > { %p1050_p6 = scmp.ge.s32.totalorder %s1439_s23, 1  ;;  %p134_p7 = scmp.eq.s32.totalorder %s131_s29, 0 }
  0x11   : > { %s2308_s28 = scalar_select %p1521_p4, 1, 0 }
  0x12   : > { %p1528_p8 = por %p153_p5, %p152_p3  ;;  %p188_p9 = scmp.lt.s32.totalorder %s1439_s23, 5 }
  0x13   : > { %s1534_s6 = scalar_select %p134_p7, %s1427_s20, %s136_s27  }
  0x14   : > { %s2309_s30 = scalar_select %p1528_p8, 1, 0 }
  0x15   : > { %p1536_p10 = pnand %p1050_p6, %p188_p9  ;;  %p1540_p11 = scmp.eq.s32.totalorder %s1048_s24, 0 }
  0x16   : > { %s210_s11 = sshll.u32 %s2299_s1, 4  ;;  %s221_s14 = sshll.u32 %s2300_s2, 4  ;;  %s211_s11 = int_to_ptr.vmem [resolvable:$true] %s210_s11  ;;  %s222_s14 = int_to_ptr.vmem [resolvable:$true] %s221_s14 }
  0x17   : > { %s2310_s7 = scalar_select %p1536_p10, 1, 0 }
  0x18   : > { %s2311_s8 = scalar_select %p1540_p11, 1, 0 }
  0x19   : > { %p1117_p12 = pneg %p1536_p10  ;;  %s1441_s16 = smov [#allocation10]  }
  0x1a   : > { %s233_s17 = sshll.u32 %s1441_s16, 4  ;;  %s1442_s24 = smov [#allocation2]   ;;  %s234_s17 = int_to_ptr.vmem [resolvable:$true] %s233_s17 }
  0x1b   : > { %p1554_p13 = pnand %p1540_p11, %p1117_p12  ;;  %s1261_s29 = scalar_lea.vmem %s211_s11, 16 }
  0x1c   : > { %p1262_p0 = scmp.ne.s32.totalorder %s211_s11, %s1261_s29  ;;  %p1269_p5 = scmp.lt.s32.totalorder %s211_s11, %s211_s11 }
  0x1d   : > { %1120 = dma.hbm_to_smem (!%p1554_p13), %s2298_s0, 16, %s1442_s24, [#allocation5]  }
  0x1e   : > { %p1263_p1 = pneg %p1554_p13  ;;  %p1270_p6 = scmp.lt.s32.totalorder %s1261_s29, %s1261_s29 }
  0x20   : > { %p1264_p2 = pnand %p1263_p1, %p1262_p0  ;;  %p1271_p7 = por %p1270_p6, %p1269_p5 }
  0x22   : > { %p1265_p3 = pneg %p1264_p2 }
  0x24   : > { %p1272_p9 = pnand %p1271_p7, %p1265_p3 }
  0x26   : > { %1275 = shalt.err (!%p1272_p9)
}
  0x27   : > { %s1443_s9 = smov [#allocation7]   ;;  %s1276_s10 = scalar_lea.vmem %s222_s14, 32 }
  0x28   : > { %1123 = dma.vmem_to_smem (!%p1554_p13), %s211_s11, 16, %s1443_s9, [#allocation6]  }
  0x29   : > { %p1277_p12 = scmp.ne.s32.totalorder %s222_s14, %s1276_s10  ;;  %p1284_p11 = scmp.lt.s32.totalorder %s222_s14, %s222_s14 }
  0x2a   : > { %p1285_p10 = scmp.lt.s32.totalorder %s1276_s10, %s1276_s10 }
  0x2b   : > { %p1279_p8 = pnand %p1277_p12, %p1263_p1 }
  0x2c   : > { %p1286_p0 = por %p1285_p10, %p1284_p11 }
  0x2d   : > { %p1280_p4 = pneg %p1279_p8 }
  0x2f   : > { %p1287_p2 = pnand %p1286_p0, %p1280_p4 }
  0x31   : > { %1290 = shalt.err (!%p1287_p2)
}
  0x32   : > { %s1444_s12 = smov [#allocation8]   ;;  %s1302_s13 = scalar_lea.vmem %s234_s17, 1024 }
  0x33   : > { %1126 = dma.vmem_to_smem (!%p1554_p13), %s222_s14, 32, %s1444_s12, [#allocation9]  }
  0x34   : > { %p1303_p3 = scmp.ne.s32.totalorder %s234_s17, %s1302_s13  ;;  %p1310_p7 = scmp.lt.s32.totalorder %s234_s17, %s234_s17 }
  0x35   : > { %p1311_p9 = scmp.lt.s32.totalorder %s1302_s13, %s1302_s13 }
  0x36   : > { %p1305_p5 = pnand %p1303_p3, %p1263_p1 }
  0x37   : > { %p1312_p8 = por %p1311_p9, %p1310_p7 }
  0x38   : > { %p1306_p6 = pneg %p1305_p5 }
  0x3a   : > { %p1313_p12 = pnand %p1312_p8, %p1306_p6 }
  0x3c   : > { %1316 = shalt.err (!%p1313_p12)
}
  0x3d   : > { %s1445_s11 = smov 128   ;;  %s1446_s16 = smov 8  }
  0x3e   : > { %1129 = dma.hbm_to_vmem [thread:$0]  (!%p1554_p13), %s2301_s3, 1024, %s234_s17, [#allocation3], %s1445_s11, %s1445_s11, %s1446_s16  }
  0x3f   : > { %p2313_p4 = scmp.ne.s32.totalorder %s2310_s7, 0 }
  0x40   : > { %p2314_p10 = scmp.ne.s32.totalorder (!%p2313_p4), %s2311_s8, 0 }
  0x41   : > { %249 = sbr.rel (%p2313_p4) target bundleno = 523 (0x20b), region = 36 }
  0x46   : > { %1394 = dma.done.wait (%p2314_p10), [#allocation5], 16  }
  0x47   : > { %1396 = vsyncadd (%p2314_p10), [#allocation5], 4294967280 }
  0x48   : > { %1398 = dma.done.wait (%p2314_p10), [#allocation6], 16  }
  0x49   : > { %1400 = vsyncadd (%p2314_p10), [#allocation6], 4294967280 }
  0x4a   : > { %1402 = dma.done.wait (%p2314_p10), [#allocation9], 32  }
  0x4b   : > { %1404 = vsyncadd (%p2314_p10), [#allocation9], 4294967264 }
  0x4c   : > { %1406 = dma.done.wait (%p2314_p10), [#allocation3], 1024  }
  0x4d   : > { %1408 = vsyncadd (%p2314_p10), [#allocation3], 4294966272 }
  0x4e   : > { %267 = sfence }
  0x4f   : > { %s1602_s7 = smul.u32 48, %s1431_s21  ;;  %v1610_v0 = vld [vmem:[#allocation10] sm:$0xff]  ;;  %v1613_v1 = vld [vmem:[#allocation10 + $0x8] sm:$0xff]  ;;  %v1616_v2 = vld [vmem:[#allocation10 + $0x10] sm:$0xff]  ;;  %p2315_p13 = scmp.ne.s32.totalorder %s2308_s28, 0 }
  0x50   : > { %v1618_v4 = vld [vmem:[#allocation10 + $0x18] sm:$0xff]  ;;  %v1623_v7 = vld [vmem:[#allocation10 + $0x20] sm:$0xff]  ;;  %v1628_v10 = vld [vmem:[#allocation10 + $0x28] sm:$0xff] }
  0x51   : > { %s313_s14 = sadd.s32 1, %s1602_s7  ;;  %s309_s15 = sld [smem:[#allocation8 + %s1602_s7]]  ;;  %v1640_v17 = vld [vmem:[#allocation10 + $0x30] sm:$0xff]  ;;  %v1648_v25 = vld [vmem:[#allocation10 + $0x38] sm:$0xff] }
  0x52   : > { %s319_s17 = sadd.s32 2, %s1602_s7  ;;  %s314_s27 = sld [smem:[#allocation8 + %s313_s14]] }
  0x53   : > { %s325_s29 = sadd.s32 3, %s1602_s7  ;;  %s320_s9 = sld [smem:[#allocation8 + %s319_s17]] }
  0x54   : > { %s331_s8 = sadd.s32 4, %s1602_s7  ;;  %s326_s10 = sld [smem:[#allocation8 + %s325_s29]] }
  0x55   : > { %s337_s12 = sadd.s32 5, %s1602_s7  ;;  %s332_s13 = sld [smem:[#allocation8 + %s331_s8]] }
  0x56   : > { %s343_s11 = sadd.s32 6, %s1602_s7  ;;  %s338_s16 = sld [smem:[#allocation8 + %s337_s12]] }
  0x57   : > { %s349_s24 = sadd.s32 7, %s1602_s7  ;;  %v310_v3 = vstv %s309_s15  ;;  %s344_s25 = sld [smem:[#allocation8 + %s343_s11]] }
  0x58   : > { %v1621_v5 = vsub.f32 %v1610_v0, %v310_v3  ;;  %v315_v6 = vstv %s314_s27  ;;  %s350_s14 = sld [smem:[#allocation8 + %s349_s24]]  ;;  %s1653_s15 = smul.u32 6, %s1431_s21 }
  0x59   : > { %v1626_v8 = vsub.f32 %v1613_v1, %v315_v6  ;;  %v321_v9 = vstv %s320_s9  ;;  %s1660_s27 = sadd.s32 8, %s1602_s7 }
  0x5a   : > { %v312_v11 = vmul.f32 %v1621_v5, %v1621_v5  ;;  %v1633_v12 = vsub.f32 %v1616_v2, %v321_v9  ;;  %v327_v13 = vstv %s326_s10  ;;  %s306_s17 = sld [smem:[#allocation2 + %s1653_s15]]  ;;  %s405_s9 = sadd.s32 1, %s1660_s27 }
  0x5b   : > { %v317_v14 = vmul.f32 %v1626_v8, %v1626_v8  ;;  %v1638_v15 = vsub.f32 %v1618_v4, %v327_v13  ;;  %v333_v16 = vstv %s332_s13  ;;  %s307_s29 = sld [smem:[#allocation7 + %s1653_s15]]  ;;  %s411_s8 = sadd.s32 2, %s1660_s27 }
  0x5c   : > { %v323_v18 = vmul.f32 %v1633_v12, %v1633_v12  ;;  %v334_v19 = vsub.f32 %v1623_v7, %v333_v16  ;;  %v339_v20 = vstv %s338_s16  ;;  %s1666_s10 = sld [smem:[#allocation8 + %s1660_s27]]  ;;  %s417_s13 = sadd.s32 3, %s1660_s27 }
  0x5d   : > { %v318_v21 = vadd.f32 %v317_v14, %v312_v11  ;;  %v329_v22 = vmul.f32 %v1638_v15, %v1638_v15  ;;  %v340_v23 = vsub.f32 %v1628_v10, %v339_v20  ;;  %v345_v24 = vstv %s344_s25  ;;  %s1668_s12 = sld [smem:[#allocation8 + %s405_s9]]  ;;  %s423_s16 = sadd.s32 4, %s1660_s27 }
  0x5e   : > { %v351_v26 = vstv %s350_s14  ;;  %v335_v28 = vmul.f32 %v334_v19, %v334_v19  ;;  %v346_v29 = vsub.f32 %v1640_v17, %v345_v24  ;;  %s1671_s11 = sld [smem:[#allocation8 + %s411_s8]]  ;;  %s429_s25 = sadd.s32 5, %s1660_s27 }
  0x5f   : > { %v324_v27 = vadd.f32 %v323_v18, %v318_v21  ;;  %v341_v31 = vmul.f32 %v340_v23, %v340_v23  ;;  %v352_v32 = vsub.f32 %v1648_v25, %v351_v26  ;;  %s1674_s24 = sld [smem:[#allocation8 + %s417_s13]]  ;;  %s441_s8 = sadd.s32 7, %s1660_s27 }
  0x60   : > { %v347_v34 = vmul.f32 %v346_v29, %v346_v29  ;;  %v362_v42 = vstv %s306_s17  ;;  %s1677_s14 = sld [smem:[#allocation8 + %s423_s16]]  ;;  %s435_s17 = sadd.s32 6, %s1660_s27 }
  0x61   : > { %v330_v30 = vadd.f32 %v329_v22, %v324_v27  ;;  %v353_v36 = vmul.f32 %v352_v32, %v352_v32  ;;  %v368_v49 = vstv %s307_s29  ;;  %s1682_s9 = sld [smem:[#allocation8 + %s429_s25]]  ;;  %s397_s29 = sadd.s32 1, %s1653_s15 }
  0x62   : > { %v402_v52 = vstv %s1666_s10  ;;  %s1691_s13 = sld [smem:[#allocation8 + %s435_s17]] }
  0x63   : > { %v336_v33 = vadd.f32 %v335_v28, %v330_v30  ;;  %v407_v53 = vstv %s1668_s12  ;;  %s442_s27 = sld [smem:[#allocation8 + %s441_s8]]  ;;  %s1762_s12 = sadd.s32 16, %s1602_s7 }
  0x64   : > { %v413_v54 = vstv %s1671_s11  ;;  %s398_s10 = sld [smem:[#allocation2 + %s397_s29]]  ;;  %s497_s16 = sadd.s32 1, %s1762_s12 }
  0x65   : > { %v342_v35 = vadd.f32 %v341_v31, %v336_v33  ;;  %v419_v62 = vstv %s1674_s24  ;;  %s399_s11 = sld [smem:[#allocation7 + %s397_s29]]  ;;  %s503_s24 = sadd.s32 2, %s1762_s12 }
  0x66   : > { %s1767_s25 = sld [smem:[#allocation8 + %s1762_s12]]  ;;  %s509_s17 = sadd.s32 3, %s1762_s12 }
  0x67   : > { %v348_v37 = vadd.f32 %v347_v34, %v342_v35  ;;  %s515_s8 = sadd.s32 4, %s1762_s12 }
  0x68   : > { %v437_v18 = vstv %s1691_s13  ;;  %s1775_s13 = sld [smem:[#allocation8 + %s509_s17]] }
  0x69   : > { %v354_v38 = vadd.f32 %v353_v36, %v348_v37  ;;  %v443_v22 = vstv %s442_s27  ;;  %s521_s27 = sadd.s32 5, %s1762_s12  ;;  %s1778_s29 = sld [smem:[#allocation8 + %s515_s8]] }
  0x6b   : > { %1202 = vrsqrt.f32 %v354_v38  ;;  %vm357_vm0 = vcmp.eq.f32.partialorder %v354_v38, inf  ;;  %v360_v40 = vand.u32 2147483648, %v354_v38  ;;  %vm359_vm1 = vcmp.eq.f32.partialorder %v354_v38, 0.0 }
  0x78   : > { %v1203_v39 = vpop.eup %1202 }
  0x79   : > { %v356_v41 = vmul.f32 %v1203_v39, %v354_v38 }
  0x7b   : > { %v358_v43 = vsel %vm357_vm0, %v354_v38, %v356_v41  ;;  %v454_v38 = vstv %s398_s10  ;;  %s527_s10 = sadd.s32 6, %s1762_s12 }
  0x7c   : > { %v1656_v44 = vsel %vm359_vm1, %v360_v40, %v358_v43  ;;  %s1792_s17 = sld [smem:[#allocation8 + %s527_s10]] }
  0x7d   : > { %v363_v45 = vadd.f32 %v362_v42, %v1656_v44 }
  0x7f   : > { %1204 = vrcp.f32 %v363_v45 }
  0x8c   : > { %v1205_v46 = vpop.eup %1204 }
  0x8d   : > { %v365_v47 = vmul.f32 %v1205_v46, %v363_v45 }
  0x8f   : > { %v366_v48 = vsub.f32 2.0, %v365_v47 }
  0x91   : > { %v1679_v50 = vmul.f32 %v1205_v46, %v366_v48  ;;  %v460_v46 = vstv %s399_s11  ;;  %s489_s11 = sadd.s32 2, %s1653_s15 }
  0x93   : > { %v1685_v51 = vmul.f32 %v368_v49, %v1679_v50  ;;  %v494_v49 = vstv %s1767_s25  ;;  %s490_s25 = sld [smem:[#allocation2 + %s489_s11]] }
  0x95   : > { %v370_v55 = vmul.f32 %v1685_v51, %v1621_v5  ;;  %v372_v56 = vmul.f32 %v1685_v51, %v1626_v8  ;;  %v374_v57 = vmul.f32 %v1685_v51, %v1633_v12  ;;  %v376_v58 = vmul.f32 %v1685_v51, %v1638_v15 }
  0x96   : > { %v378_v59 = vmul.f32 %v1685_v51, %v334_v19  ;;  %v380_v60 = vmul.f32 %v1685_v51, %v340_v23  ;;  %v382_v61 = vmul.f32 %v1685_v51, %v346_v29  ;;  %v384_v11 = vmul.f32 %v1685_v51, %v352_v32 }
  0x97   : > { %v1706_v63 = vadd.f32 %v370_v55, %v1610_v0  ;;  %v1709_v3 = vadd.f32 %v372_v56, %v1613_v1  ;;  %v1712_v5 = vadd.f32 %v374_v57, %v1616_v2  ;;  %v1715_v6 = vadd.f32 %v376_v58, %v1618_v4 }
  0x98   : > { %v1718_v8 = vadd.f32 %v378_v59, %v1623_v7  ;;  %v1721_v9 = vadd.f32 %v380_v60, %v1628_v10  ;;  %v425_v0 = vstv %s1677_s14  ;;  %v1738_v7 = vadd.f32 %v382_v61, %v1640_v17  ;;  %s1769_s14 = sld [smem:[#allocation8 + %s497_s16]] }
  0x99   : > { %v1726_v12 = vsub.f32 %v1706_v63, %v402_v52  ;;  %v1729_v1 = vsub.f32 %v1709_v3, %v407_v53  ;;  %v1732_v2 = vsub.f32 %v1712_v5, %v413_v54  ;;  %v1735_v4 = vsub.f32 %v1715_v6, %v419_v62  ;;  %s1783_s16 = sld [smem:[#allocation8 + %s521_s27]] }
  0x9a   : > { %v431_v10 = vstv %s1682_s9  ;;  %v426_v16 = vsub.f32 %v1718_v8, %v425_v0  ;;  %v1750_v19 = vadd.f32 %v384_v11, %v1648_v25  ;;  %v438_v26 = vsub.f32 %v1738_v7, %v437_v18  ;;  %s1772_s9 = sld [smem:[#allocation8 + %s503_s24]]  ;;  %s533_s24 = sadd.s32 7, %s1762_s12 }
  0x9b   : > { %v404_v13 = vmul.f32 %v1726_v12, %v1726_v12  ;;  %v409_v14 = vmul.f32 %v1729_v1, %v1729_v1  ;;  %v415_v15 = vmul.f32 %v1732_v2, %v1732_v2  ;;  %v421_v17 = vmul.f32 %v1735_v4, %v1735_v4  ;;  %s534_s12 = sld [smem:[#allocation8 + %s533_s24]] }
  0x9c   : > { %v432_v21 = vsub.f32 %v1721_v9, %v431_v10  ;;  %v427_v24 = vmul.f32 %v426_v16, %v426_v16  ;;  %v444_v29 = vsub.f32 %v1750_v19, %v443_v22  ;;  %v439_v31 = vmul.f32 %v438_v26, %v438_v26 }
  0x9d   : > { %v410_v20 = vadd.f32 %v409_v14, %v404_v13  ;;  %v511_v61 = vstv %s1775_s13  ;;  %v529_v18 = vstv %s1792_s17 }
  0x9e   : > { %v433_v28 = vmul.f32 %v432_v21, %v432_v21  ;;  %v445_v32 = vmul.f32 %v444_v29, %v444_v29  ;;  %v499_v52 = vstv %s1769_s14  ;;  %s1863_s14 = sadd.s32 24, %s1602_s7 }
  0x9f   : > { %v416_v23 = vadd.f32 %v415_v15, %v410_v20  ;;  %s589_s8 = sadd.s32 1, %s1863_s14  ;;  %s595_s13 = sadd.s32 2, %s1863_s14 }
  0xa0   : > { %v505_v53 = vstv %s1772_s9  ;;  %s491_s9 = sld [smem:[#allocation7 + %s489_s11]]  ;;  %s601_s10 = sadd.s32 3, %s1863_s14 }
  0xa1   : > { %v422_v27 = vadd.f32 %v421_v17, %v416_v23  ;;  %v535_v22 = vstv %s534_s12  ;;  %s1868_s27 = sld [smem:[#allocation8 + %s1863_s14]]  ;;  %s607_s24 = sadd.s32 4, %s1863_s14 }
  0xa2   : > { %s1876_s17 = sld [smem:[#allocation8 + %s601_s10]]  ;;  %s613_s12 = sadd.s32 5, %s1863_s14 }
  0xa3   : > { %v428_v30 = vadd.f32 %v427_v24, %v422_v27  ;;  %s1879_s11 = sld [smem:[#allocation8 + %s607_s24]] }
  0xa5   : > { %v434_v25 = vadd.f32 %v433_v28, %v428_v30 }
  0xa7   : > { %v440_v33 = vadd.f32 %v439_v31, %v434_v25 }
  0xa9   : > { %v446_v34 = vadd.f32 %v445_v32, %v440_v33 }
  0xab   : > { %1206 = vrsqrt.f32 %v446_v34  ;;  %vm449_vm2 = vcmp.eq.f32.partialorder %v446_v34, inf  ;;  %v452_v36 = vand.u32 2147483648, %v446_v34  ;;  %vm451_vm3 = vcmp.eq.f32.partialorder %v446_v34, 0.0 }
  0xb8   : > { %v1207_v35 = vpop.eup %1206 }
  0xb9   : > { %v448_v37 = vmul.f32 %v1207_v35, %v446_v34 }
  0xbb   : > { %v450_v39 = vsel %vm449_vm2, %v446_v34, %v448_v37  ;;  %v546_v37 = vstv %s490_s25  ;;  %s619_s25 = sadd.s32 6, %s1863_s14 }
  0xbc   : > { %v1758_v40 = vsel %vm451_vm3, %v452_v36, %v450_v39  ;;  %s1893_s10 = sld [smem:[#allocation8 + %s619_s25]] }
  0xbd   : > { %v455_v41 = vadd.f32 %v454_v38, %v1758_v40 }
  0xbf   : > { %1208 = vrcp.f32 %v455_v41 }
  0xcc   : > { %v1209_v42 = vpop.eup %1208 }
  0xcd   : > { %v457_v43 = vmul.f32 %v1209_v42, %v455_v41 }
  0xcf   : > { %v458_v45 = vsub.f32 2.0, %v457_v43 }
  0xd1   : > { %v1780_v47 = vmul.f32 %v1209_v42, %v458_v45 }
  0xd3   : > { %v1786_v48 = vmul.f32 %v460_v46, %v1780_v47  ;;  %v552_v46 = vstv %s491_s9  ;;  %s581_s9 = sadd.s32 3, %s1653_s15 }
  0xd4   : > { %s1983_s24 = sld [smem:[#allocation7 + %s581_s9]] }
  0xd5   : > { %v462_v54 = vmul.f32 %v1786_v48, %v1726_v12  ;;  %v464_v55 = vmul.f32 %v1786_v48, %v1729_v1  ;;  %v466_v56 = vmul.f32 %v1786_v48, %v1732_v2  ;;  %v468_v57 = vmul.f32 %v1786_v48, %v1735_v4 }
  0xd6   : > { %v470_v58 = vmul.f32 %v1786_v48, %v426_v16  ;;  %v472_v59 = vmul.f32 %v1786_v48, %v432_v21  ;;  %v474_v60 = vmul.f32 %v1786_v48, %v438_v26  ;;  %v476_v4 = vmul.f32 %v1786_v48, %v444_v29 }
  0xd7   : > { %v1807_v62 = vadd.f32 %v462_v54, %v1706_v63  ;;  %v1810_v11 = vadd.f32 %v464_v55, %v1709_v3  ;;  %v1813_v0 = vadd.f32 %v466_v56, %v1712_v5  ;;  %v1816_v12 = vadd.f32 %v468_v57, %v1715_v6 }
  0xd8   : > { %v1819_v1 = vadd.f32 %v470_v58, %v1718_v8  ;;  %v1822_v2 = vadd.f32 %v472_v59, %v1721_v9  ;;  %v517_v63 = vstv %s1778_s29  ;;  %v1839_v8 = vadd.f32 %v474_v60, %v1738_v7  ;;  %s1870_s29 = sld [smem:[#allocation8 + %s589_s8]] }
  0xd9   : > { %v1827_v10 = vsub.f32 %v1807_v62, %v494_v49  ;;  %v1830_v3 = vsub.f32 %v1810_v11, %v499_v52  ;;  %v1833_v5 = vsub.f32 %v1813_v0, %v505_v53  ;;  %v1836_v6 = vsub.f32 %v1816_v12, %v511_v61  ;;  %s1884_s8 = sld [smem:[#allocation8 + %s613_s12]] }
  0xda   : > { %v523_v9 = vstv %s1783_s16  ;;  %v518_v16 = vsub.f32 %v1819_v1, %v517_v63  ;;  %v1851_v20 = vadd.f32 %v476_v4, %v1750_v19  ;;  %v530_v26 = vsub.f32 %v1839_v8, %v529_v18  ;;  %s1873_s16 = sld [smem:[#allocation8 + %s595_s13]]  ;;  %s625_s13 = sadd.s32 7, %s1863_s14 }
  0xdb   : > { %v496_v13 = vmul.f32 %v1827_v10, %v1827_v10  ;;  %v501_v14 = vmul.f32 %v1830_v3, %v1830_v3  ;;  %v507_v15 = vmul.f32 %v1833_v5, %v1833_v5  ;;  %v513_v7 = vmul.f32 %v1836_v6, %v1836_v6  ;;  %s626_s14 = sld [smem:[#allocation8 + %s625_s13]] }
  0xdc   : > { %v524_v21 = vsub.f32 %v1822_v2, %v523_v9  ;;  %v519_v24 = vmul.f32 %v518_v16, %v518_v16  ;;  %v536_v29 = vsub.f32 %v1851_v20, %v535_v22  ;;  %v531_v31 = vmul.f32 %v530_v26, %v530_v26 }
  0xdd   : > { %v502_v17 = vadd.f32 %v501_v14, %v496_v13  ;;  %v586_v53 = vstv %s1868_s27  ;;  %v603_v63 = vstv %s1876_s17  ;;  %s582_s27 = sld [smem:[#allocation2 + %s581_s9]] }
  0xde   : > { %v525_v28 = vmul.f32 %v524_v21, %v524_v21  ;;  %v537_v25 = vmul.f32 %v536_v29, %v536_v29  ;;  %v591_v54 = vstv %s1870_s29  ;;  %s1980_s29 = sadd.s32 32, %s1602_s7 }
  0xdf   : > { %v508_v23 = vadd.f32 %v507_v15, %v502_v17  ;;  %s687_s17 = sadd.s32 2, %s1980_s29  ;;  %s1987_s12 = sld [smem:[#allocation8 + %s1980_s29]] }
  0xe0   : > { %v597_v55 = vstv %s1873_s16  ;;  %s681_s16 = sadd.s32 1, %s1980_s29  ;;  %s1993_s13 = sld [smem:[#allocation8 + %s687_s17]] }
  0xe1   : > { %v514_v27 = vadd.f32 %v513_v7, %v508_v23  ;;  %s1990_s25 = sld [smem:[#allocation8 + %s681_s16]]  ;;  %s711_s9 = sadd.s32 6, %s1980_s29 }
  0xe2   : > { %s2014_s17 = sld [smem:[#allocation8 + %s711_s9]] }
  0xe3   : > { %v520_v30 = vadd.f32 %v519_v24, %v514_v27 }
  0xe5   : > { %v526_v19 = vadd.f32 %v525_v28, %v520_v30 }
  0xe7   : > { %v532_v32 = vadd.f32 %v531_v31, %v526_v19 }
  0xe9   : > { %v538_v33 = vadd.f32 %v537_v25, %v532_v32 }
  0xeb   : > { %1210 = vrsqrt.f32 %v538_v33  ;;  %vm541_vm4 = vcmp.eq.f32.partialorder %v538_v33, inf  ;;  %v544_v35 = vand.u32 2147483648, %v538_v33  ;;  %vm543_vm5 = vcmp.eq.f32.partialorder %v538_v33, 0.0 }
  0xf8   : > { %v1211_v34 = vpop.eup %1210 }
  0xf9   : > { %v540_v36 = vmul.f32 %v1211_v34, %v538_v33 }
  0xfb   : > { %v542_v38 = vsel %vm541_vm4, %v538_v33, %v540_v36 }
  0xfc   : > { %v1859_v39 = vsel %vm543_vm5, %v544_v35, %v542_v38 }
  0xfd   : > { %v547_v41 = vadd.f32 %v546_v37, %v1859_v39 }
  0xff   : > { %1212 = vrcp.f32 %v547_v41 }
 0x10c   : > { %v1213_v42 = vpop.eup %1212 }
 0x10d   : > { %v549_v43 = vmul.f32 %v1213_v42, %v547_v41  ;;  %v638_v41 = vstv %s582_s27  ;;  %s705_s27 = sadd.s32 5, %s1980_s29 }
 0x10e   : > { %s2009_s16 = sld [smem:[#allocation8 + %s705_s27]] }
 0x10f   : > { %v550_v45 = vsub.f32 2.0, %v549_v43 }
 0x111   : > { %v1881_v49 = vmul.f32 %v1213_v42, %v550_v45 }
 0x113   : > { %v1887_v52 = vmul.f32 %v552_v46, %v1881_v49 }
 0x115   : > { %v554_v56 = vmul.f32 %v1887_v52, %v1827_v10  ;;  %v556_v57 = vmul.f32 %v1887_v52, %v1830_v3  ;;  %v558_v58 = vmul.f32 %v1887_v52, %v1833_v5  ;;  %v560_v59 = vmul.f32 %v1887_v52, %v1836_v6 }
 0x116   : > { %v562_v60 = vmul.f32 %v1887_v52, %v518_v16  ;;  %v564_v61 = vmul.f32 %v1887_v52, %v524_v21  ;;  %v566_v4 = vmul.f32 %v1887_v52, %v530_v26  ;;  %v568_v14 = vmul.f32 %v1887_v52, %v536_v29 }
 0x117   : > { %v1908_v10 = vadd.f32 %v554_v56, %v1807_v62  ;;  %v1911_v3 = vadd.f32 %v556_v57, %v1810_v11  ;;  %v1914_v5 = vadd.f32 %v558_v58, %v1813_v0  ;;  %v1917_v6 = vadd.f32 %v560_v59, %v1816_v12 }
 0x118   : > { %v1920_v9 = vadd.f32 %v562_v60, %v1819_v1  ;;  %v1923_v13 = vadd.f32 %v564_v61, %v1822_v2  ;;  %v609_v62 = vstv %s1879_s11  ;;  %v1940_v1 = vadd.f32 %v566_v4, %v1839_v8  ;;  %s693_s11 = sadd.s32 3, %s1980_s29 }
 0x119   : > { %v1928_v15 = vsub.f32 %v1908_v10, %v586_v53  ;;  %v1931_v11 = vsub.f32 %v1911_v3, %v591_v54  ;;  %v1934_v0 = vsub.f32 %v1914_v5, %v597_v55  ;;  %v1937_v12 = vsub.f32 %v1917_v6, %v603_v63 }
 0x11a   : > { %v615_v2 = vstv %s1884_s8  ;;  %v1950_v7 = vsub.f32 %v1920_v9, %v609_v62  ;;  %v621_v21 = vstv %s1893_s10  ;;  %v1954_v22 = vadd.f32 %v568_v14, %v1851_v20  ;;  %s699_s8 = sadd.s32 4, %s1980_s29  ;;  %s1995_s10 = sld [smem:[#allocation8 + %s693_s11]] }
 0x11b   : > { %v588_v16 = vmul.f32 %v1928_v15, %v1928_v15  ;;  %v593_v18 = vmul.f32 %v1931_v11, %v1931_v11  ;;  %v599_v17 = vmul.f32 %v1934_v0, %v1934_v0  ;;  %v605_v8 = vmul.f32 %v1937_v12, %v1937_v12 }
 0x11c   : > { %v1959_v24 = vsub.f32 %v1923_v13, %v615_v2  ;;  %v627_v26 = vstv %s626_s14  ;;  %v611_v28 = vmul.f32 %v1950_v7, %v1950_v7  ;;  %v1964_v29 = vsub.f32 %v1940_v1, %v621_v21  ;;  %s1997_s14 = sld [smem:[#allocation8 + %s699_s8]] }
 0x11d   : > { %v594_v23 = vadd.f32 %v593_v18, %v588_v16  ;;  %v1969_v31 = vsub.f32 %v1954_v22, %v627_v26  ;;  %v390_v54 = vmul.f32 %v1685_v51, %v1679_v50  ;;  %v482_v55 = vmul.f32 %v1786_v48, %v1780_v47 }
 0x11e   : > { %v617_v20 = vmul.f32 %v1959_v24, %v1959_v24  ;;  %v623_v25 = vmul.f32 %v1964_v29, %v1964_v29  ;;  %v386_v57 = vadd.f32 1.0, %v1685_v51  ;;  %v478_v59 = vadd.f32 1.0, %v1786_v48 }
 0x11f   : > { %v600_v27 = vadd.f32 %v599_v17, %v594_v23  ;;  %v629_v33 = vmul.f32 %v1969_v31, %v1969_v31  ;;  %v391_v58 = vmul.f32 %v390_v54, %v1656_v44  ;;  %v644_v60 = vstv %s1983_s24  ;;  %s717_s24 = sadd.s32 7, %s1980_s29 }
 0x120   : > { %v483_v50 = vmul.f32 %v482_v55, %v1758_v40  ;;  %v574_v47 = vmul.f32 %v1887_v52, %v1881_v49  ;;  %v570_v48 = vadd.f32 1.0, %v1887_v52  ;;  %v678_v14 = vstv %s1987_s12  ;;  %s2031_s29 = sld [smem:[#allocation8 + %s717_s24]]  ;;  %s673_s12 = sadd.s32 4, %s1653_s15 }
 0x121   : > { %v606_v30 = vadd.f32 %v605_v8, %v600_v27  ;;  %v392_v51 = vsub.f32 %v386_v57, %v391_v58  ;;  %v683_v62 = vstv %s1990_s25  ;;  %v689_v2 = vstv %s1993_s13  ;;  %s674_s11 = sld [smem:[#allocation2 + %s673_s12]]  ;;  %s2109_s25 = sadd.s32 40, %s1602_s7 }
 0x122   : > { %v484_v44 = vsub.f32 %v478_v59, %v483_v50  ;;  %v575_v4 = vmul.f32 %v574_v47, %v1859_v39  ;;  %v695_v40 = vstv %s1995_s10  ;;  %v701_v16 = vstv %s1997_s14  ;;  %s773_s8 = sadd.s32 1, %s2109_s25  ;;  %s675_s13 = sld [smem:[#allocation7 + %s673_s12]] }
 0x123   : > { %v612_v19 = vadd.f32 %v611_v28, %v606_v30  ;;  %v707_v27 = vstv %s2009_s16  ;;  %s779_s10 = sadd.s32 2, %s2109_s25  ;;  %s2114_s14 = sld [smem:[#allocation8 + %s2109_s25]] }
 0x124   : > { %v576_v49 = vsub.f32 %v570_v48, %v575_v4  ;;  %s785_s27 = sadd.s32 3, %s2109_s25  ;;  %s2117_s9 = sld [smem:[#allocation8 + %s773_s8]] }
 0x125   : > { %v618_v32 = vadd.f32 %v617_v20, %v612_v19  ;;  %s2119_s16 = sld [smem:[#allocation8 + %s779_s10]]  ;;  %s791_s7 = sadd.s32 4, %s2109_s25 }
 0x126   : > { %s797_s24 = sadd.s32 5, %s2109_s25  ;;  %s803_s12 = sadd.s32 6, %s2109_s25 }
 0x127   : > { %v624_v34 = vadd.f32 %v623_v25, %v618_v32  ;;  %s2130_s8 = sld [smem:[#allocation8 + %s803_s12]]  ;;  %s809_s10 = sadd.s32 7, %s2109_s25 }
 0x128   : > { %s2145_s25 = sld [smem:[#allocation8 + %s809_s10]]  ;;  %s1447_s10 = smov [#allocation11]  }
 0x129   : > { %v630_v35 = vadd.f32 %v629_v33, %v624_v34 }
 0x12b   : > { %1214 = vrsqrt.f32 %v630_v35  ;;  %vm633_vm6 = vcmp.eq.f32.partialorder %v630_v35, inf  ;;  %v636_v37 = vand.u32 2147483648, %v630_v35  ;;  %vm635_vm7 = vcmp.eq.f32.partialorder %v630_v35, 0.0 }
 0x138   : > { %v1215_v36 = vpop.eup %1214 }
 0x139   : > { %v632_v38 = vmul.f32 %v1215_v36, %v630_v35  ;;  %v719_v36 = vstv %s2031_s29  ;;  %s2125_s29 = sld [smem:[#allocation8 + %s791_s7]] }
 0x13b   : > { %v634_v42 = vsel %vm633_vm6, %v630_v35, %v632_v38 }
 0x13c   : > { %v1976_v43 = vsel %vm635_vm7, %v636_v37, %v634_v42 }
 0x13d   : > { %v639_v45 = vadd.f32 %v638_v41, %v1976_v43 }
 0x13f   : > { %1216 = vrcp.f32 %v639_v45 }
 0x140   : > { %1218 = vlog2.f32 %v386_v57 }
 0x141   : > { %1220 = vlog2.f32 %v478_v59 }
 0x142   : > { %1222 = vlog2.f32 %v392_v51 }
 0x143   : > { %1224 = vlog2.f32 %v484_v44 }
 0x144   : > { %1226 = vlog2.f32 %v570_v48 }
 0x145   : > { %1228 = vlog2.f32 %v576_v49 }
 0x14c   : > { %v1217_v46 = vpop.eup %1216 }
 0x14d   : > { %v641_v53 = vmul.f32 %v1217_v46, %v639_v45  ;;  %v1219_v34 = vpop.eup %1218 }
 0x14e   : > { %v1221_v37 = vpop.eup %1220  ;;  %v388_v55 = vmul.f32 0.6931472, %v1219_v34 }
 0x14f   : > { %v642_v56 = vsub.f32 2.0, %v641_v53  ;;  %v1223_v42 = vpop.eup %1222 }
 0x150   : > { %v1225_v57 = vpop.eup %1224  ;;  %v389_v50 = vmul.f32 7.0, %v388_v55  ;;  %v394_v47 = vmul.f32 0.6931472, %v1223_v42  ;;  %v775_v42 = vstv %s2117_s9 }
 0x151   : > { %v643_v61 = vmul.f32 %v1217_v46, %v642_v56  ;;  %v480_v56 = vmul.f32 0.6931472, %v1221_v37  ;;  %v486_v51 = vmul.f32 0.6931472, %v1225_v57  ;;  %v1227_v4 = vpop.eup %1226  ;;  %v736_v37 = vstv %s675_s13  ;;  %s765_s13 = sadd.s32 5, %s1653_s15 }
 0x152   : > { %s767_s15 = sld [smem:[#allocation7 + %s765_s13]] }
 0x153   : > { %v645_v63 = vmul.f32 %v644_v60, %v643_v61 }
 0x155   : > { %v646_v18 = vmul.f32 %v645_v63, %v1928_v15  ;;  %v648_v17 = vmul.f32 %v645_v63, %v1931_v11  ;;  %v650_v21 = vmul.f32 %v645_v63, %v1934_v0  ;;  %v652_v52 = vmul.f32 %v645_v63, %v1937_v12 }
 0x156   : > { %v654_v39 = vmul.f32 %v645_v63, %v1950_v7  ;;  %v656_v23 = vmul.f32 %v645_v63, %v1959_v24  ;;  %v658_v8 = vmul.f32 %v645_v63, %v1964_v29  ;;  %v660_v24 = vmul.f32 %v645_v63, %v1969_v31 }
 0x157   : > { %v2034_v26 = vadd.f32 %v646_v18, %v1908_v10  ;;  %v2037_v15 = vadd.f32 %v648_v17, %v1911_v3  ;;  %v2040_v11 = vadd.f32 %v650_v21, %v1914_v5  ;;  %v2043_v0 = vadd.f32 %v652_v52, %v1917_v6 }
 0x158   : > { %v2046_v12 = vadd.f32 %v654_v39, %v1920_v9  ;;  %v2049_v7 = vadd.f32 %v656_v23, %v1923_v13  ;;  %v2066_v9 = vadd.f32 %v658_v8, %v1940_v1  ;;  %v713_v13 = vstv %s2014_s17  ;;  %s2122_s17 = sld [smem:[#allocation8 + %s785_s27]]  ;;  %s2205_s27 = sand.u32 1, %s1423_s19  }
 0x159   : > { %v2054_v10 = vsub.f32 %v2034_v26, %v678_v14  ;;  %v2057_v3 = vsub.f32 %v2037_v15, %v683_v62  ;;  %v2060_v5 = vsub.f32 %v2040_v11, %v689_v2  ;;  %v2063_v6 = vsub.f32 %v2043_v0, %v695_v40  ;;  %v1229_v62 = vpop.eup %1228  ;;  %s1060_s9 = sshll.u32 %s2205_s27, 6 }
 0x15a   : > { %v2076_v20 = vsub.f32 %v2046_v12, %v701_v16  ;;  %v2079_v31 = vadd.f32 %v660_v24, %v1954_v22  ;;  %v2084_v19 = vsub.f32 %v2049_v7, %v707_v27  ;;  %v662_v32 = vadd.f32 1.0, %v645_v63 }
 0x15b   : > { %v680_v28 = vmul.f32 %v2054_v10, %v2054_v10  ;;  %v685_v29 = vmul.f32 %v2057_v3, %v2057_v3  ;;  %v691_v30 = vmul.f32 %v2060_v5, %v2060_v5  ;;  %v697_v1 = vmul.f32 %v2063_v6, %v2063_v6 }
 0x15c   : > { %v666_v33 = vmul.f32 %v645_v63, %v643_v61  ;;  %v2087_v35 = vsub.f32 %v2066_v9, %v713_v13  ;;  %v703_v22 = vmul.f32 %v2076_v20, %v2076_v20  ;;  %1230 = vlog2.f32 %v662_v32 }
 0x15d   : > { %v686_v25 = vadd.f32 %v685_v29, %v680_v28  ;;  %v709_v46 = vmul.f32 %v2084_v19, %v2084_v19  ;;  %v2096_v53 = vsub.f32 %v2079_v31, %v719_v36  ;;  %v481_v61 = vmul.f32 7.0, %v480_v56 }
 0x15e   : > { %v667_v41 = vmul.f32 %v666_v33, %v1976_v43  ;;  %v715_v59 = vmul.f32 %v2087_v35, %v2087_v35  ;;  %v395_v63 = vadd.f32 %v394_v47, %v389_v50  ;;  %v572_v40 = vmul.f32 0.6931472, %v1227_v4 }
 0x15f   : > { %v692_v38 = vadd.f32 %v691_v30, %v686_v25  ;;  %v721_v43 = vmul.f32 %v2096_v53, %v2096_v53  ;;  %v487_v14 = vadd.f32 %v486_v51, %v481_v61  ;;  %v578_v16 = vmul.f32 0.6931472, %v1229_v62 }
 0x160   : > { %v668_v54 = vsub.f32 %v662_v32, %v667_v41  ;;  %v573_v17 = vmul.f32 7.0, %v572_v40  ;;  %v730_v30 = vstv %s674_s11  ;;  %s2128_s11 = sld [smem:[#allocation8 + %s797_s24]]  ;;  %v770_v41 = vstv %s2114_s14 }
 0x161   : > { %v698_v45 = vadd.f32 %v697_v1, %v692_v38  ;;  %v488_v18 = vadd.f32 %v487_v14, %v395_v63  ;;  %s766_s14 = sld [smem:[#allocation2 + %s765_s13]] }
 0x162   : > { %1232 = vlog2.f32 %v668_v54  ;;  %v579_v39 = vadd.f32 %v578_v16, %v573_v17 }
 0x163   : > { %v704_v58 = vadd.f32 %v703_v22, %v698_v45  ;;  %v781_v45 = vstv %s2119_s16  ;;  %s282_s16 = scalar_lea.vmem [#allocation11], %s1060_s9 }
 0x164   : > { %v580_v8 = vadd.f32 %v579_v39, %v488_v18  ;;  %s893_s7 = sshll.u32 %s282_s16, 4  ;;  %s2214_s7 = int_to_ptr.vmem [resolvable:$true] %s893_s7 }
 0x165   : > { %v710_v60 = vadd.f32 %v709_v46, %v704_v58  ;;  %v787_v46 = vstv %s2122_s17  ;;  %s1091_s17 = sshll.u32 %s1431_s21, 10 }
 0x166   : > { %s2222_s12 = scalar_lea.hbm %s2302_s4, %s1091_s17 }
 0x167   : > { %v716_v44 = vadd.f32 %v715_v59, %v710_v60 }
 0x169   : > { %v722_v48 = vadd.f32 %v721_v43, %v716_v44  ;;  %v1231_v2 = vpop.eup %1230  ;;  %v793_v43 = vstv %s2125_s29 }
 0x16a   : > { %v664_v49 = vmul.f32 0.6931472, %v1231_v2  ;;  %v811_v2 = vstv %s2145_s25  ;;  %s1321_s25 = sshll.u32 %s1447_s10, 4  ;;  %s1322_s25 = int_to_ptr.vmem [resolvable:$false] %s1321_s25 }
 0x16b   : > { %1234 = vrsqrt.f32 %v722_v48  ;;  %vm725_vm8 = vcmp.eq.f32.partialorder %v722_v48, inf  ;;  %v728_v28 = vand.u32 2147483648, %v722_v48  ;;  %vm727_vm9 = vcmp.eq.f32.partialorder %v722_v48, 0.0  ;;  %s1323_s13 = scalar_lea.vmem %s1322_s25, 2048  ;;  %p1324_p2 = scmp.lt.s32.totalorder %s2214_s7, %s1322_s25 }
 0x16c   : > { %v665_v21 = vmul.f32 7.0, %v664_v49 }
 0x16f   : > { %v1233_v52 = vpop.eup %1232 }
 0x170   : > { %v670_v23 = vmul.f32 0.6931472, %v1233_v52 }
 0x172   : > { %v671_v24 = vadd.f32 %v670_v23, %v665_v21 }
 0x174   : > { %v2103_v27 = vadd.f32 %v671_v24, %v580_v8 }
 0x178   : > { %v1235_v13 = vpop.eup %1234 }
 0x179   : > { %v724_v29 = vmul.f32 %v1235_v13, %v722_v48 }
 0x17b   : > { %v726_v1 = vsel %vm725_vm8, %v722_v48, %v724_v29 }
 0x17c   : > { %v2105_v25 = vsel %vm727_vm9, %v728_v28, %v726_v1 }
 0x17d   : > { %v731_v32 = vadd.f32 %v730_v30, %v2105_v25 }
 0x17f   : > { %1236 = vrcp.f32 %v731_v32 }
 0x18c   : > { %v1237_v33 = vpop.eup %1236 }
 0x18d   : > { %v733_v34 = vmul.f32 %v1237_v33, %v731_v32 }
 0x18f   : > { %v734_v36 = vsub.f32 2.0, %v733_v34 }
 0x191   : > { %v735_v38 = vmul.f32 %v1237_v33, %v734_v36 }
 0x193   : > { %v737_v22 = vmul.f32 %v736_v37, %v735_v38 }
 0x195   : > { %v738_v54 = vmul.f32 %v737_v22, %v2054_v10  ;;  %v740_v55 = vmul.f32 %v737_v22, %v2057_v3  ;;  %v742_v56 = vmul.f32 %v737_v22, %v2060_v5  ;;  %v744_v57 = vmul.f32 %v737_v22, %v2063_v6 }
 0x196   : > { %v746_v58 = vmul.f32 %v737_v22, %v2076_v20  ;;  %v748_v59 = vmul.f32 %v737_v22, %v2084_v19  ;;  %v750_v60 = vmul.f32 %v737_v22, %v2087_v35  ;;  %v752_v19 = vmul.f32 %v737_v22, %v2096_v53 }
 0x197   : > { %v2148_v50 = vadd.f32 %v738_v54, %v2034_v26  ;;  %v2151_v10 = vadd.f32 %v740_v55, %v2037_v15  ;;  %v2154_v3 = vadd.f32 %v742_v56, %v2040_v11  ;;  %v2157_v5 = vadd.f32 %v744_v57, %v2043_v0 }
 0x198   : > { %v2160_v6 = vadd.f32 %v746_v58, %v2046_v12  ;;  %v2163_v20 = vadd.f32 %v748_v59, %v2049_v7  ;;  %v799_v35 = vstv %s2128_s11  ;;  %v2180_v12 = vadd.f32 %v750_v60, %v2066_v9  ;;  %s874_s11 = scalar_lea.sflag [#allocation4], %s2205_s27 }
 0x199   : > { %v2168_v26 = vsub.f32 %v2148_v50, %v770_v41  ;;  %v2171_v15 = vsub.f32 %v2151_v10, %v775_v42  ;;  %v2174_v11 = vsub.f32 %v2154_v3, %v781_v45  ;;  %v2177_v0 = vsub.f32 %v2157_v5, %v787_v46 }
 0x19a   : > { %v805_v7 = vstv %s2130_s8  ;;  %v794_v51 = vsub.f32 %v2160_v6, %v793_v43  ;;  %v2191_v44 = vadd.f32 %v752_v19, %v2079_v31  ;;  %v800_v48 = vsub.f32 %v2163_v20, %v799_v35  ;;  %s1317_s8 = scalar_lea.vmem %s2214_s7, 1024 }
 0x19b   : > { %v772_v53 = vmul.f32 %v2168_v26, %v2168_v26  ;;  %v777_v47 = vmul.f32 %v2171_v15, %v2171_v15  ;;  %v783_v61 = vmul.f32 %v2174_v11, %v2174_v11  ;;  %v789_v9 = vmul.f32 %v2177_v0, %v2177_v0  ;;  %p1318_p11 = scmp.ne.s32.totalorder %s2214_s7, %s1317_s8  ;;  %p1325_p3 = scmp.lt.s32.totalorder %s1323_s13, %s1317_s8 }
 0x19c   : > { %v754_v63 = vadd.f32 1.0, %v737_v22  ;;  %v758_v14 = vmul.f32 %v737_v22, %v735_v38  ;;  %v806_v62 = vsub.f32 %v2180_v12, %v805_v7  ;;  %v795_v16 = vmul.f32 %v794_v51, %v794_v51 }
 0x19d   : > { %v778_v4 = vadd.f32 %v777_v47, %v772_v53  ;;  %v801_v31 = vmul.f32 %v800_v48, %v800_v48  ;;  %v812_v17 = vsub.f32 %v2191_v44, %v811_v2  ;;  %v822_v38 = vstv %s766_s14  ;;  %p1319_p1 = pnand %p1318_p11, %p2315_p13  ;;  %p1326_p5 = por %p1325_p3, %p1324_p2 }
 0x19e   : > { %1238 = vlog2.f32 %v754_v63  ;;  %v759_v49 = vmul.f32 %v758_v14, %v2105_v25  ;;  %v807_v39 = vmul.f32 %v806_v62, %v806_v62  ;;  %v828_v54 = vstv %s767_s15 }
 0x19f   : > { %v784_v40 = vadd.f32 %v783_v61, %v778_v4  ;;  %v813_v8 = vmul.f32 %v812_v17, %v812_v17  ;;  %p1320_p0 = pneg %p1319_p1 }
 0x1a0   : > { %v760_v21 = vsub.f32 %v754_v63, %v759_v49 }
 0x1a1   : > { %v790_v18 = vadd.f32 %v789_v9, %v784_v40  ;;  %p1327_p6 = pnand %p1326_p5, %p1320_p0 }
 0x1a2   : > { %1240 = vlog2.f32 %v760_v21 }
 0x1a3   : > { %v796_v52 = vadd.f32 %v795_v16, %v790_v18 }
 0x1a5   : > { %v802_v23 = vadd.f32 %v801_v31, %v796_v52 }
 0x1a7   : > { %v808_v24 = vadd.f32 %v807_v39, %v802_v23 }
 0x1a9   : > { %v814_v13 = vadd.f32 %v813_v8, %v808_v24 }
 0x1ab   : > { %1242 = vrsqrt.f32 %v814_v13  ;;  %v1239_v28 = vpop.eup %1238  ;;  %vm817_vm10 = vcmp.eq.f32.partialorder %v814_v13, inf  ;;  %v820_v36 = vand.u32 2147483648, %v814_v13  ;;  %vm819_vm11 = vcmp.eq.f32.partialorder %v814_v13, 0.0 }
 0x1ac   : > { %v756_v29 = vmul.f32 0.6931472, %v1239_v28 }
 0x1ae   : > { %v757_v30 = vmul.f32 7.0, %v756_v29 }
 0x1af   : > { %v1241_v1 = vpop.eup %1240 }
 0x1b0   : > { %v762_v25 = vmul.f32 0.6931472, %v1241_v1 }
 0x1b2   : > { %v763_v32 = vadd.f32 %v762_v25, %v757_v30 }
 0x1b4   : > { %v2202_v33 = vadd.f32 %v763_v32, %v2103_v27 }
 0x1b8   : > { %v1243_v34 = vpop.eup %1242 }
 0x1b9   : > { %v816_v37 = vmul.f32 %v1243_v34, %v814_v13 }
 0x1bb   : > { %v818_v22 = vsel %vm817_vm10, %v814_v13, %v816_v37 }
 0x1bc   : > { %v821_v41 = vsel %vm819_vm11, %v820_v36, %v818_v22 }
 0x1bd   : > { %v823_v42 = vadd.f32 %v822_v38, %v821_v41 }
 0x1bf   : > { %1244 = vrcp.f32 %v823_v42 }
 0x1cc   : > { %v1245_v45 = vpop.eup %1244 }
 0x1cd   : > { %v825_v46 = vmul.f32 %v1245_v45, %v823_v42 }
 0x1cf   : > { %v826_v27 = vsub.f32 2.0, %v825_v46 }
 0x1d1   : > { %v827_v55 = vmul.f32 %v1245_v45, %v826_v27 }
 0x1d3   : > { %v829_v56 = vmul.f32 %v828_v54, %v827_v55 }
 0x1d5   : > { %v830_v57 = vmul.f32 %v829_v56, %v2168_v26  ;;  %v832_v58 = vmul.f32 %v829_v56, %v2171_v15  ;;  %v834_v59 = vmul.f32 %v829_v56, %v2174_v11  ;;  %v836_v60 = vmul.f32 %v829_v56, %v2177_v0 }
 0x1d6   : > { %v838_v43 = vmul.f32 %v829_v56, %v794_v51  ;;  %v840_v19 = vmul.f32 %v829_v56, %v800_v48  ;;  %v842_v35 = vmul.f32 %v829_v56, %v806_v62  ;;  %v844_v7 = vmul.f32 %v829_v56, %v812_v17 }
 0x1d7   : > { %v831_v53 = vadd.f32 %v830_v57, %v2148_v50  ;;  %v833_v47 = vadd.f32 %v832_v58, %v2151_v10  ;;  %v835_v61 = vadd.f32 %v834_v59, %v2154_v3  ;;  %v837_v26 = vadd.f32 %v836_v60, %v2157_v5 }
 0x1d8   : > { %v839_v15 = vadd.f32 %v838_v43, %v2160_v6  ;;  %v841_v11 = vadd.f32 %v840_v19, %v2163_v20  ;;  %v843_v50 = vadd.f32 %v842_v35, %v2180_v12  ;;  %v845_v10 = vadd.f32 %v844_v7, %v2191_v44 }
 0x1d9   : > { %857 = vst [vmem:[%s282_s16] sm:$0xff] %v831_v53  ;;  %1067 = vst [vmem:[%s282_s16 + $0x8] sm:$0xff] %v833_v47  ;;  %v846_v3 = vadd.f32 1.0, %v829_v56  ;;  %v850_v5 = vmul.f32 %v829_v56, %v827_v55 }
 0x1da   : > { %1068 = vst [vmem:[%s282_s16 + $0x10] sm:$0xff] %v835_v61  ;;  %1069 = vst [vmem:[%s282_s16 + $0x18] sm:$0xff] %v837_v26 }
 0x1db   : > { %1070 = vst [vmem:[%s282_s16 + $0x20] sm:$0xff] %v839_v15  ;;  %1071 = vst [vmem:[%s282_s16 + $0x28] sm:$0xff] %v841_v11  ;;  %1246 = vlog2.f32 %v846_v3  ;;  %v851_v6 = vmul.f32 %v850_v5, %v821_v41 }
 0x1dc   : > { %1072 = vst [vmem:[%s282_s16 + $0x30] sm:$0xff] %v843_v50  ;;  %1073 = vst [vmem:[%s282_s16 + $0x38] sm:$0xff] %v845_v10 }
 0x1dd   : > { %1330 = shalt.err (!%p1327_p6)
}
 0x1de   : > { %s1331_s14 = scalar_lea.hbm %s2222_s12, 1024  ;;  %s1335_s16 = scalar_lea.hbm %s2302_s4, 4096 }
 0x1df   : > { %p1332_p7 = scmp.ne.s32.totalorder %s2222_s12, %s1331_s14  ;;  %p1336_p12 = scmp.lt.s32.totalorder %s2222_s12, %s2302_s4 }
 0x1e0   : > { %p1337_p4 = scmp.lt.s32.totalorder %s1335_s16, %s1331_s14 }
 0x1e1   : > { %p1333_p9 = pnand %p1332_p7, %p2315_p13 }
 0x1e2   : > { %p1338_p10 = por %p1337_p4, %p1336_p12 }
 0x1e3   : > { %p1334_p8 = pneg %p1333_p9 }
 0x1e5   : > { %p1339_p11 = pnand %p1338_p10, %p1334_p8 }
 0x1e7   : > { %1342 = shalt.err (!%p1339_p11)
}
 0x1e8   : > { %s1448_s29 = smov 128   ;;  %s1449_s8 = smov 8   ;;  %v852_v20 = vsub.f32 %v846_v3, %v851_v6  ;;  %v1247_v0 = vpop.eup %1246 }
 0x1e9   : > { %1113 = dma.vmem_to_hbm [thread:$0]  (%p2315_p13), %s2214_s7, 1024, %s2222_s12, %s874_s11, %s1448_s29, %s1448_s29, %s1449_s8   ;;  %v848_v12 = vmul.f32 0.6931472, %v1247_v0 }
 0x1ea   : > { %1248 = vlog2.f32 %v852_v20  ;;  %s1061_s10 = sshll.u32 %s2205_s27, 3  ;;  %s1078_s14 = sshll.u32 %s1431_s21, 7 }
 0x1eb   : > { %v849_v51 = vmul.f32 7.0, %v848_v12  ;;  %s289_s25 = scalar_lea.vmem [#allocation12], %s1061_s10  ;;  %s908_s11 = scalar_lea.hbm %s2303_s5, %s1078_s14 }
 0x1ec   : > { %s910_s13 = sshll.u32 %s289_s25, 4  ;;  %s879_s15 = scalar_lea.sflag [#allocation13], %s2205_s27  ;;  %s2253_s13 = int_to_ptr.vmem [resolvable:$true] %s910_s13 }
 0x1ed   : > { %s1343_s9 = scalar_lea.vmem %s2253_s13, 128  ;;  %s1450_s21 = smov [#allocation12]  }
 0x1ee   : > { %p1344_p1 = scmp.ne.s32.totalorder %s2253_s13, %s1343_s9  ;;  %s1347_s16 = sshll.u32 %s1450_s21, 4  ;;  %s1348_s16 = int_to_ptr.vmem [resolvable:$false] %s1347_s16 }
 0x1ef   : > { %s1349_s17 = scalar_lea.vmem %s1348_s16, 256  ;;  %p1350_p3 = scmp.lt.s32.totalorder %s2253_s13, %s1348_s16 }
 0x1f0   : > { %p1345_p0 = pnand %p1344_p1, %p2315_p13  ;;  %p1351_p5 = scmp.lt.s32.totalorder %s1349_s17, %s1343_s9 }
 0x1f2   : > { %p1346_p2 = pneg %p1345_p0  ;;  %p1352_p6 = por %p1351_p5, %p1350_p3 }
 0x1f4   : > { %p1353_p7 = pnand %p1352_p6, %p1346_p2 }
 0x1f7   : > { %v1249_v44 = vpop.eup %1248 }
 0x1f8   : > { %v854_v48 = vmul.f32 0.6931472, %v1249_v44 }
 0x1fa   : > { %v855_v4 = vadd.f32 %v854_v48, %v849_v51 }
 0x1fc   : > { %v856_v9 = vadd.f32 %v855_v4, %v2202_v33 }
 0x1fe   : > { %872 = vst [vmem:[%s289_s25] sm:$0xff] %v856_v9 }
 0x1ff   : > { %1356 = shalt.err (!%p1353_p7)
}
 0x200   : > { %s1357_s24 = scalar_lea.hbm %s908_s11, 128  ;;  %s1361_s8 = scalar_lea.hbm %s2303_s5, 512 }
 0x201   : > { %p1358_p9 = scmp.ne.s32.totalorder %s908_s11, %s1357_s24  ;;  %p1362_p4 = scmp.lt.s32.totalorder %s908_s11, %s2303_s5 }
 0x202   : > { %p1363_p10 = scmp.lt.s32.totalorder %s1361_s8, %s1357_s24 }
 0x203   : > { %p1359_p8 = pnand %p1358_p9, %p2315_p13 }
 0x204   : > { %p1364_p11 = por %p1363_p10, %p1362_p4 }
 0x205   : > { %p1360_p12 = pneg %p1359_p8 }
 0x207   : > { %p1365_p1 = pnand %p1364_p11, %p1360_p12 }
 0x209   : > { %1368 = shalt.err (!%p1365_p1)
}
 0x20a   : > { %1114 = dma.vmem_to_hbm [thread:$0]  (%p2315_p13), %s2253_s13, 128, %s908_s11, %s879_s15  }
 0x20b PF: > { %p1145_p0 = scmp.ge.s32.totalorder %s1439_s23, 2  ;;  %s922_s14 = sand.u32 1, %s1419_s18  }
 0x20c   : > { %p2316_p2 = scmp.ne.s32.totalorder %s2309_s30, 0  ;;  %s923_s7 = scalar_lea.sflag [#allocation4], %s922_s14 }
 0x20e   : > { %p1131_p3 = pnand %p1145_p0, %p2316_p2 }
 0x210   : > { %p1132_p5 = pneg %p1131_p3 }
 0x212   : > { %1410 = dma.done.wait (%p1132_p5), %s923_s7, 1024  }
 0x213   : > { %1412 = vsyncadd (%p1132_p5), %s923_s7, 4294966272  ;;  %s932_s12 = scalar_lea.sflag [#allocation13], %s922_s14 }
 0x214   : > { %1414 = dma.done.wait (%p1132_p5), %s932_s12, 128  }
 0x215   : > { %1416 = vsyncadd (%p1132_p5), %s932_s12, 4294967168  ;;  %s26_s23 = sadd.s32 1, %s1439_s23   ;;  %s2317_s18 = smov %s1423_s19 }
 0x216   : > { %p23_p6 = scmp.ge.s32.totalorder %s26_s23, 6   ;;  %s2318_s19 = smov %s1427_s20 }
 0x217   : > { %s2319_s20 = smov %s1534_s6  ;;  %s2320_s21 = smov %s1435_s22 }
 0x218   : > { %s2321_s22 = smov %s2323_s26  ;;  %25 = sbr.rel (!%p23_p6) target bundleno = 10 (0xa), region = 119 }
 0x21d   :  { %937 = vsyncpa [#allocation3], 1 }
 0x21e   :  { %939 = vsyncpa [#allocation3 + $0x1], 1 }
 0x21f   :  { %940 = vsyncpa [#allocation4], 1 }
 0x220   :  { %942 = vsyncpa [#allocation4 + $0x1], 1 }
 0x221   :  { %943 = vsyncpa [#allocation13], 1 }
 0x222   :  { %945 = vsyncpa [#allocation13 + $0x1], 1 }
 0x223   :  { %946 = vsyncpa [#allocation5], 1 }
 0x224   :  { %948 = vsyncpa [#allocation5 + $0x1], 1 }
 0x225   :  { %949 = vsyncpa [#allocation6], 1 }
 0x226   :  { %951 = vsyncpa [#allocation6 + $0x1], 1 }
 0x227   :  { %952 = vsyncpa [#allocation9], 1 }

</bundles_post_ra>
